<compile_context>
chip_gen: v7x
topology: tpu7x:2x2x1
jax: 0.10.0
libtpu: 0.0.40
codegen_flags: <defaults>
</compile_context>

<pallas_src>
import math
import functools

import jax
import jax.numpy as jnp
from jax import lax
from jax.experimental import pallas as pl
from jax.experimental.pallas import tpu as pltpu


def _round_up(x, m):
    return ((x + m - 1) // m) * m


def _pick_s_tile(s, target=512):
    """Largest multiple of 8 that divides s and is <= target (else s itself)."""
    t = min(target, s)
    t -= t % 8
    for cand in range(t, 7, -8):
        if s % cand == 0:
            return cand
    return s


# --------------------------------------------------------------------------
# Kernel 1: fused 1x1x1 Conv3d + GroupNorm(32) over all feature scales.
#   grid = (scale, batch, pass, S_tile); pass 0 = stats, pass 1 = normalize.
# --------------------------------------------------------------------------
def _input_proj_kernel(x_ref, w_ref, b_ref, gamma_ref, beta_ref, gm_ref,
                       o_ref, sum_scr, sumsq_scr, scale_scr, shift_scr,
                       *, count_rows, count_group, eps):
    p = pl.program_id(2)      # 0 = stats pass, 1 = normalize pass
    st = pl.program_id(3)     # S-tile index

    # 1x1x1 conv == matmul over channels; bf16 MXU inputs, f32 accumulation.
    # The conv bias is NOT added here: it is folded into the scale/shift at
    # (pass 1, tile 0), which removes one VALU add per element per pass.
    x = x_ref[0, 0]                                             # [S_tile, Cin_pad] bf16
    w = w_ref[0]                                                # [Cin_pad, Cout_pad] bf16
    y = jnp.dot(x, w, preferred_element_type=jnp.float32)       # [S_tile, Cout_pad] f32

    @pl.when((p == 0) & (st == 0))
    def _():
        sum_scr[...] = jnp.zeros_like(sum_scr)
        sumsq_scr[...] = jnp.zeros_like(sumsq_scr)

    @pl.when(p == 0)
    def _():
        # Column sums via MXU ones-row dots (keeps the XLU free).
        ones = jnp.ones((1, y.shape[0]), jnp.float32)
        sum_scr[...] += jnp.dot(ones, y, preferred_element_type=jnp.float32)
        sumsq_scr[...] += jnp.dot(ones, y * y, preferred_element_type=jnp.float32)

    @pl.when((p == 1) & (st == 0))
    def _():
        gm = gm_ref[...]                                        # [Cout_pad, G_pad]
        b = b_ref[0]                                            # [1, Cout_pad]
        # Shift per-channel raw-matmul stats by the conv bias:
        #   sum(y_raw + b)   = sum_raw + S*b
        #   sum((y_raw+b)^2) = sumsq_raw + 2*b*sum_raw + S*b^2
        sum_y = sum_scr[...] + count_rows * b
        sumsq_y = sumsq_scr[...] + 2.0 * b * sum_scr[...] + count_rows * b * b
        grp_sum = jnp.dot(sum_y, gm, preferred_element_type=jnp.float32)
        grp_sumsq = jnp.dot(sumsq_y, gm, preferred_element_type=jnp.float32)
        inv_count = 1.0 / count_group
        mean_g = grp_sum * inv_count
        # clamp: E[y^2] - E[y]^2 can go slightly negative from f32 cancellation
        var_g = jnp.maximum(grp_sumsq * inv_count - mean_g * mean_g, 0.0)
        inv_g = lax.rsqrt(var_g + eps)
        # scatter group statistics back to channels (contract over group axis)
        dn = (((1,), (1,)), ((), ()))
        mean_c = lax.dot_general(mean_g, gm, dn, preferred_element_type=jnp.float32)
        inv_c = lax.dot_general(inv_g, gm, dn, preferred_element_type=jnp.float32)
        # fold conv bias + GroupNorm affine:  out = y_raw * scale + shift
        scale = inv_c * gamma_ref[0]
        scale_scr[...] = scale
        shift_scr[...] = beta_ref[0] + (b - mean_c) * scale

    @pl.when(p == 1)
    def _():
        o_ref[0, 0] = (y * scale_scr[...] + shift_scr[...]).astype(o_ref.dtype)


def input_proj_fused(x_list, params, *, num_groups=32, eps=1e-5, s_tile_target=512):
    """Fused input_proj for all feature scales.

    x_list: list of [N, S, Cin_l] channels-last feature maps (same N, S per scale).
    params: list of (w [Cin_l, Cout], b [Cout], gamma [Cout], beta [Cout]).
    Returns [num_scales, N, S, Cout_pad] f32; caller slices [..., :Cout].
    # TODO(synk): real FPN scales have different spatial shapes; those need
    #             per-scale calls (or S-padding) instead of stacking into one array.
    """
    ns = len(x_list)
    n, s, _ = x_list[0].shape
    cout = params[0][0].shape[1]
    cg = cout // num_groups                    # channels per group
    cin_pad = _round_up(max(x.shape[-1] for x in x_list), 128)
    cout_pad = _round_up(cout, 128)
    assert cout_pad % cg == 0
    g_pad = _round_up(cout_pad // cg, 128)

    # Host-side packing: pad Cin/Cout to lane-clean multiples of 128; activations
    # and weights go to HBM as bf16 (halves the dominant HBM read).
    x_p = jnp.zeros((ns, n, s, cin_pad), jnp.bfloat16)
    w_p = jnp.zeros((ns, cin_pad, cout_pad), jnp.bfloat16)
    b_p = jnp.zeros((ns, 1, cout_pad), jnp.float32)
    gamma_p = jnp.zeros((ns, 1, cout_pad), jnp.float32)
    beta_p = jnp.zeros((ns, 1, cout_pad), jnp.float32)
    for i, (x, (w, b, g, bt)) in enumerate(zip(x_list, params)):
        cin = x.shape[-1]
        x_p = x_p.at[i, :, :, :cin].set(x.astype(jnp.bfloat16))
        w_p = w_p.at[i, :cin, :cout].set(w.astype(jnp.bfloat16))
        b_p = b_p.at[i, 0, :cout].set(b)
        gamma_p = gamma_p.at[i, 0, :cout].set(g)
        beta_p = beta_p.at[i, 0, :cout].set(bt)

    # channel -> group one-hot; padded channels land in their own pad groups
    # (their gamma/beta are 0, so padded output columns are exactly 0).
    grp = jnp.arange(cout_pad) // cg
    gm = (grp[:, None] == jnp.arange(g_pad)[None, :]).astype(jnp.float32)

    s_tile = _pick_s_tile(s, s_tile_target)    # sized to fit v7x's 64 MiB VMEM easily
    n_s_tiles = s // s_tile
    kernel = functools.partial(_input_proj_kernel,
                               count_rows=float(s), count_group=float(s * cg), eps=eps)

    return pl.pallas_call(
        kernel,
        out_shape=jax.ShapeDtypeStruct((ns, n, s, cout_pad), jnp.float32),
        grid_spec=pltpu.PrefetchScalarGridSpec(
            num_scalar_prefetch=0,
            grid=(ns, n, 2, n_s_tiles),
            in_specs=[
                pl.BlockSpec((1, 1, s_tile, cin_pad), lambda sc, nb, p, t: (sc, nb, t, 0)),
                pl.BlockSpec((1, cin_pad, cout_pad), lambda sc, nb, p, t: (sc, 0, 0)),
                pl.BlockSpec((1, 1, cout_pad), lambda sc, nb, p, t: (sc, 0, 0)),
                pl.BlockSpec((1, 1, cout_pad), lambda sc, nb, p, t: (sc, 0, 0)),
                pl.BlockSpec((1, 1, cout_pad), lambda sc, nb, p, t: (sc, 0, 0)),
                pl.BlockSpec((cout_pad, g_pad), lambda sc, nb, p, t: (0, 0)),
            ],
            # pass 0 parks the output window on tile 0; it is rewritten at
            # (pass 1, tile 0) before the window ever moves, so no garbage
            # (and no wasted writeback bandwidth) reaches HBM.
            out_specs=pl.BlockSpec((1, 1, s_tile, cout_pad),
                                   lambda sc, nb, p, t: (sc, nb, p * t, 0)),
            scratch_shapes=[pltpu.VMEM((1, cout_pad), jnp.float32)] * 4,
        ),
        compiler_params=pltpu.CompilerParams(
            dimension_semantics=("parallel", "parallel", "arbitrary", "arbitrary"),
            vmem_limit_bytes=32 * 1024 * 1024,
        ),
    )(x_p, w_p, b_p, gamma_p, beta_p, gm)


# --------------------------------------------------------------------------
# Kernel 2: per-decoder-layer detection heads, single grid step.
#   class_embed[l](hs_cls[l]) and bbox_embed[l](hs_loc[l]) fused into one
#   padded 128-wide output; tmp += inverse_sigmoid(reference); sigmoid.
# --------------------------------------------------------------------------
def _heads_kernel(hc_ref, hl_ref, ref_ref, w1_ref, b1_ref, w2_ref, b2_ref,
                  wch_ref, w3h_ref, bf_ref, o_ref, *, num_layers, num_classes):
    c = num_classes
    bq, ow = o_ref.shape[1], o_ref.shape[2]
    col = lax.broadcasted_iota(jnp.int32, (bq, ow), 1)
    coord_mask = (col >= c) & (col < c + 6)

    for l in range(num_layers):                 # L is tiny & static: full unroll
        hc = hc_ref[l]                          # [BQ_pad, H_pad]
        hl = hl_ref[l]
        t = jnp.maximum(jnp.dot(hl, w1_ref[l], preferred_element_type=jnp.float32)
                        + b1_ref[l], 0.0)
        t = jnp.maximum(jnp.dot(t, w2_ref[l], preferred_element_type=jnp.float32)
                        + b2_ref[l], 0.0)
        # class head (cols [0,C)) and bbox last layer (cols [C,C+6)) fused into
        # one lane-dense padded output slab.
        fused = (jnp.dot(hc, wch_ref[l], preferred_element_type=jnp.float32)
                 + jnp.dot(t, w3h_ref[l], preferred_element_type=jnp.float32)
                 + bf_ref[l])
        r = jnp.clip(ref_ref[l], 0.0, 1.0)
        inv_sig = jnp.log(jnp.clip(r, 1e-5, None) / jnp.clip(1.0 - r, 1e-5, None))
        shifted = fused + jnp.where(coord_mask, inv_sig, 0.0)
        o_ref[l] = jnp.where(coord_mask, jax.nn.sigmoid(shifted), fused)


def detection_heads(hs_cls, hs_loc, refs, wc, bc, w1, b1, w2, b2, w3, b3):
    """hs_cls / hs_loc: [L, BQ, H]; refs: [L, BQ, R] (R = 6 or 3).
    Weights stacked over L: wc [L,H,C], bc [L,C], w1/w2 [L,H,H], b1/b2 [L,H],
    w3 [L,H,6], b3 [L,6].  Returns (logits [L,BQ,C], boxes [L,BQ,6])."""
    L, BQ, H = hs_cls.shape
    C = wc.shape[-1]
    R = refs.shape[-1]
    h_pad = _round_up(H, 128)
    out_pad = _round_up(C + 6, 128)
    bq_pad = _round_up(BQ, 8)
    f32 = jnp.float32

    hc_p = jnp.zeros((L, bq_pad, h_pad), f32).at[:, :BQ, :H].set(hs_cls)
    hl_p = jnp.zeros((L, bq_pad, h_pad), f32).at[:, :BQ, :H].set(hs_loc)
    # refs placed at the coord columns; 0.5 elsewhere => inverse_sigmoid == 0,
    # which also handles the 3-coord reference case (tmp[..., :3] += reference).
    ref_p = jnp.full((L, bq_pad, out_pad), 0.5, f32).at[:, :BQ, C:C + R].set(refs)
    w1_p = jnp.zeros((L, h_pad, h_pad), f32).at[:, :H, :H].set(w1)
    b1_p = jnp.zeros((L, 1, h_pad), f32).at[:, 0, :H].set(b1)
    w2_p = jnp.zeros((L, h_pad, h_pad), f32).at[:, :H, :H].set(w2)
    b2_p = jnp.zeros((L, 1, h_pad), f32).at[:, 0, :H].set(b2)
    wch_p = jnp.zeros((L, h_pad, out_pad), f32).at[:, :H, :C].set(wc)
    w3h_p = jnp.zeros((L, h_pad, out_pad), f32).at[:, :H, C:C + 6].set(w3)
    bf_p = (jnp.zeros((L, 1, out_pad), f32)
            .at[:, 0, :C].set(bc).at[:, 0, C:C + 6].set(b3))

    kernel = functools.partial(_heads_kernel, num_layers=L, num_classes=C)
    full = lambda shape: pl.BlockSpec(shape, lambda i: (0, 0, 0))

    out = pl.pallas_call(
        kernel,
        out_shape=jax.ShapeDtypeStruct((L, bq_pad, out_pad), f32),
        grid_spec=pltpu.PrefetchScalarGridSpec(
            num_scalar_prefetch=0,
            grid=(1,),
            in_specs=[
                full((L, bq_pad, h_pad)), full((L, bq_pad, h_pad)),
                full((L, bq_pad, out_pad)),
                full((L, h_pad, h_pad)), full((L, 1, h_pad)),
                full((L, h_pad, h_pad)), full((L, 1, h_pad)),
                full((L, h_pad, out_pad)), full((L, h_pad, out_pad)),
                full((L, 1, out_pad)),
            ],
            out_specs=full((L, bq_pad, out_pad)),
        ),
        compiler_params=pltpu.CompilerParams(
            dimension_semantics=("arbitrary",),
            vmem_limit_bytes=32 * 1024 * 1024,
        ),
    )(hc_p, hl_p, ref_p, w1_p, b1_p, w2_p, b2_p, wch_p, w3h_p, bf_p)

    return out[:, :BQ, :C], out[:, :BQ, C:C + 6]


# --------------------------------------------------------------------------
# Pure-JAX references (for correctness check)
# --------------------------------------------------------------------------
def ref_input_proj(x_nsc, w, b, gamma, beta, groups=32, eps=1e-5):
    # same precision policy as the kernel: bf16 MXU inputs, f32 accumulation,
    # f32 statistics/normalization.
    y = jnp.einsum('nsc,cd->nsd', x_nsc.astype(jnp.bfloat16), w.astype(jnp.bfloat16),
                   preferred_element_type=jnp.float32) + b
    N, S, C = y.shape
    yg = y.reshape(N, S, groups, C // groups)
    mean = yg.mean(axis=(1, 3), keepdims=True)
    var = yg.var(axis=(1, 3), keepdims=True)
    yn = (yg - mean) / jnp.sqrt(var + eps)
    return yn.reshape(N, S, C) * gamma + beta


def ref_heads(hs_cls, hs_loc, refs, wc, bc, w1, b1, w2, b2, w3, b3):
    logits = jnp.einsum('lbh,lhc->lbc', hs_cls, wc) + bc[:, None, :]
    t = jax.nn.relu(jnp.einsum('lbh,lhk->lbk', hs_loc, w1) + b1[:, None, :])
    t = jax.nn.relu(jnp.einsum('lbh,lhk->lbk', t, w2) + b2[:, None, :])
    t = jnp.einsum('lbh,lhk->lbk', t, w3) + b3[:, None, :]
    r = jnp.clip(refs, 0.0, 1.0)
    inv = jnp.log(jnp.clip(r, 1e-5, None) / jnp.clip(1.0 - r, 1e-5, None))
    return logits, jax.nn.sigmoid(t + inv)


# --------------------------------------------------------------------------
if __name__ == "__main__":
    key = jax.random.PRNGKey(0)
    keys = iter(jax.random.split(key, 64))

    # ---- module hyperparameters (small, consistent with __init__) ----
    num_visits = 2
    batch_groups = 1                 # "n // num_visits"
    N = batch_groups * num_visits    # backbone batch dim
    hidden_dim = 64                  # must be divisible by GroupNorm groups (32)
    num_queries = 8
    num_classes = 4
    dec_layers = 3
    D, Hs, Ws = 4, 16, 16            # feature-map spatial dims
    S = D * Hs * Ws                  # 1024 -> two 512-row S tiles per batch element
    in_channels = [64, 80, 96, 128]  # the 4 feature scales
    num_scales = len(in_channels)

    # ---- deterministic parameter init ----
    proj_params = []
    for cin in in_channels:
        w = jax.random.normal(next(keys), (cin, hidden_dim), jnp.float32) * 0.02
        b = jnp.zeros((hidden_dim,), jnp.float32)
        gamma = jnp.ones((hidden_dim,), jnp.float32)   # GroupNorm defaults
        beta = jnp.zeros((hidden_dim,), jnp.float32)
        proj_params.append((w, b, gamma, beta))

    prior_prob = 0.01
    bias_value = -math.log((1 - prior_prob) / prior_prob)
    wc = jax.random.normal(next(keys), (dec_layers, hidden_dim, num_classes), jnp.float32) * 0.02
    bc = jnp.full((dec_layers, num_classes), bias_value, jnp.float32)
    w1 = jax.random.normal(next(keys), (dec_layers, hidden_dim, hidden_dim), jnp.float32) * 0.02
    b1 = jnp.zeros((dec_layers, hidden_dim), jnp.float32)
    w2 = jax.random.normal(next(keys), (dec_layers, hidden_dim, hidden_dim), jnp.float32) * 0.02
    b2 = jnp.zeros((dec_layers, hidden_dim), jnp.float32)
    w3 = jnp.zeros((dec_layers, hidden_dim, 6), jnp.float32)          # bbox last layer = 0
    b3 = jnp.zeros((dec_layers, 6), jnp.float32).at[0, 3:].set(-3.0)  # bbox_embed[0] bias[3:]

    # ---- synthetic backbone features (stand-in for self.backbone output) ----
    feats = [jax.random.normal(next(keys), (N, c, D, Hs, Ws), jnp.float32)
             for c in in_channels]
    x_list = [f.transpose(0, 2, 3, 4, 1).reshape(N, S, c)       # NCDHW -> [N, S, C]
              for f, c in zip(feats, in_channels)]

    # ---- step: input projections (single fused Pallas kernel for all scales) ----
    y_all = input_proj_fused(x_list, proj_params)               # [NS, N, S, Cout_pad]
    jax.block_until_ready(y_all)

    srcs = []
    for l in range(num_scales):
        y = y_all[l, :, :, :hidden_dim]
        y_ref = ref_input_proj(x_list[l], *proj_params[l])
        assert jnp.allclose(y, y_ref, atol=2e-3, rtol=2e-3), f"input_proj scale {l} mismatch"
        # glue: back to NCDHW and the (n//num_visits, num_visits, c, d, h, w) reshape
        y_ncdhw = y.reshape(N, D, Hs, Ws, hidden_dim).transpose(0, 4, 1, 2, 3)
        srcs.append(y_ncdhw.reshape(N // num_visits, num_visits, hidden_dim, D, Hs, Ws))

    # ---- synthetic visual_decoder outputs (stand-ins) ----
    B = 2                                   # decoder batch
    BQ = B * num_queries
    hs_cls = jax.random.normal(next(keys), (dec_layers, BQ, hidden_dim), jnp.float32)
    hs_loc = jax.random.normal(next(keys), (dec_layers, BQ, hidden_dim), jnp.float32)
    init_reference = jax.nn.sigmoid(jax.random.normal(next(keys), (BQ, 6), jnp.float32))
    inter_references = jax.nn.sigmoid(
        jax.random.normal(next(keys), (dec_layers - 1, BQ, 6), jnp.float32))
    refs = jnp.concatenate([init_reference[None], inter_references], axis=0)  # [L, BQ, 6]

    # ---- step: detection heads (single Pallas call, all layers fused) ----
    cls_out, coord_out = detection_heads(hs_cls, hs_loc, refs,
                                         wc, bc, w1, b1, w2, b2, w3, b3)
    jax.block_until_ready((cls_out, coord_out))

    cls_ref, coord_ref = ref_heads(hs_cls, hs_loc, refs, wc, bc, w1, b1, w2, b2, w3, b3)
    assert jnp.allclose(cls_out, cls_ref, atol=2e-3, rtol=2e-3), "class head mismatch"
    assert jnp.allclose(coord_out, coord_ref, atol=2e-3, rtol=2e-3), "bbox head mismatch"

    outputs = {
        'pred_labels': cls_out[-1].reshape(B, num_queries, num_classes),
        'pred_boxes': coord_out[-1].reshape(B, num_queries, 6),
    }
    jax.block_until_ready(outputs)
    print("KERNEL_OK")
</pallas_src>

<mosaic_0001>
module attributes {stable_mosaic.version = 11 : i64} {
  func.func @_input_proj_kernel(%arg0: i32, %arg1: i32, %arg2: i32, %arg3: i32, %arg4: memref<1x1x512x128xbf16, #tpu.memory_space<vmem>>, %arg5: memref<1x128x128xbf16, #tpu.memory_space<vmem>>, %arg6: memref<1x1x128xf32, #tpu.memory_space<vmem>>, %arg7: memref<1x1x128xf32, #tpu.memory_space<vmem>>, %arg8: memref<1x1x128xf32, #tpu.memory_space<vmem>>, %arg9: memref<128x128xf32, #tpu.memory_space<vmem>>, %arg10: memref<1x1x512x128xf32, #tpu.memory_space<vmem>>, %arg11: memref<1x128xf32, #tpu.memory_space<vmem>>, %arg12: memref<1x128xf32, #tpu.memory_space<vmem>>, %arg13: memref<1x128xf32, #tpu.memory_space<vmem>>, %arg14: memref<1x128xf32, #tpu.memory_space<vmem>>) attributes {dimension_semantics = [#tpu.dimension_semantics<parallel>, #tpu.dimension_semantics<parallel>, #tpu.dimension_semantics<arbitrary>, #tpu.dimension_semantics<arbitrary>], iteration_bounds = array<i64: 4, 2, 2, 2>, scalar_prefetch = 0 : i64, scratch_operands = 4 : i64, tpu.core_type = #tpu.core_type<tc>, window_params = [{transform_indices = @transform_0, window_bounds = array<i64: 1, 1, 512, 128>}, {transform_indices = @transform_1, window_bounds = array<i64: 1, 128, 128>}, {transform_indices = @transform_2, window_bounds = array<i64: 1, 1, 128>}, {transform_indices = @transform_3, window_bounds = array<i64: 1, 1, 128>}, {transform_indices = @transform_4, window_bounds = array<i64: 1, 1, 128>}, {pipeline_mode = #tpu.pipeline_mode<synchronous>, transform_indices = @transform_5, window_bounds = array<i64: 128, 128>}, {transform_indices = @transform_6, window_bounds = array<i64: 1, 1, 512, 128>}]} {
    %c0 = arith.constant 0 : index
    %c0_0 = arith.constant 0 : index
    %c0_1 = arith.constant 0 : index
    %c0_2 = arith.constant 0 : index
    %0 = vector.load %arg4[%c0, %c0_0, %c0_1, %c0_2] : memref<1x1x512x128xbf16, #tpu.memory_space<vmem>>, vector<1x1x512x128xbf16>
    %1 = vector.shape_cast %0 : vector<1x1x512x128xbf16> to vector<512x128xbf16>
    %c0_3 = arith.constant 0 : index
    %c0_4 = arith.constant 0 : index
    %c0_5 = arith.constant 0 : index
    %2 = vector.load %arg5[%c0_3, %c0_4, %c0_5] : memref<1x128x128xbf16, #tpu.memory_space<vmem>>, vector<1x128x128xbf16>
    %3 = vector.shape_cast %2 : vector<1x128x128xbf16> to vector<128x128xbf16>
    %cst = arith.constant dense<0.000000e+00> : vector<512x128xf32>
    %4 = tpu.matmul %1, %3, %cst {dimension_numbers = #tpu.dot_dimension_numbers<[1], [0], [0], [1], [0, 0, 1, 1], [], []>} : vector<512x128xbf16>, vector<128x128xbf16>, vector<512x128xf32> -> vector<512x128xf32>
    %c0_i32 = arith.constant 0 : i32
    %5 = arith.cmpi eq, %arg2, %c0_i32 : i32
    %c0_i32_6 = arith.constant 0 : i32
    %6 = arith.cmpi eq, %arg3, %c0_i32_6 : i32
    %7 = arith.andi %5, %6 : i1
    %8 = arith.extui %7 : i1 to i32
    %c0_i32_7 = arith.constant 0 : i32
    %9 = arith.cmpi ne, %8, %c0_i32_7 : i32
    scf.if %9 {
      %cst_14 = arith.constant 0.000000e+00 : f32
      %21 = vector.broadcast %cst_14 : f32 to vector<1x128xf32>
      %c0_15 = arith.constant 0 : index
      %c0_16 = arith.constant 0 : index
      %22 = vector.load %arg11[%c0_15, %c0_16] : memref<1x128xf32, #tpu.memory_space<vmem>>, vector<1x128xf32>
      tpu.vector_store %arg11[%c0_15, %c0_16], %21 {strides = array<i32>} : memref<1x128xf32, #tpu.memory_space<vmem>>, vector<1x128xf32>,
      %cst_17 = arith.constant 0.000000e+00 : f32
      %23 = vector.broadcast %cst_17 : f32 to vector<1x128xf32>
      %c0_18 = arith.constant 0 : index
      %c0_19 = arith.constant 0 : index
      %24 = vector.load %arg12[%c0_18, %c0_19] : memref<1x128xf32, #tpu.memory_space<vmem>>, vector<1x128xf32>
      tpu.vector_store %arg12[%c0_18, %c0_19], %23 {strides = array<i32>} : memref<1x128xf32, #tpu.memory_space<vmem>>, vector<1x128xf32>,
    } else {
    }
    %c0_i32_8 = arith.constant 0 : i32
    %10 = arith.cmpi eq, %arg2, %c0_i32_8 : i32
    %11 = arith.extui %10 : i1 to i32
    %c0_i32_9 = arith.constant 0 : i32
    %12 = arith.cmpi ne, %11, %c0_i32_9 : i32
    scf.if %12 {
      %cst_14 = arith.constant 1.000000e+00 : f32
      %21 = vector.broadcast %cst_14 : f32 to vector<1x512xf32>
      %c0_15 = arith.constant 0 : index
      %c0_16 = arith.constant 0 : index
      %22 = vector.load %arg11[%c0_15, %c0_16] : memref<1x128xf32, #tpu.memory_space<vmem>>, vector<1x128xf32>
      %cst_17 = arith.constant dense<0.000000e+00> : vector<1x128xf32>
      %23 = tpu.matmul %21, %4, %cst_17 {dimension_numbers = #tpu.dot_dimension_numbers<[1], [0], [0], [1], [0, 0, 1, 1], [], []>} : vector<1x512xf32>, vector<512x128xf32>, vector<1x128xf32> -> vector<1x128xf32>
      %24 = arith.addf %22, %23 : vector<1x128xf32>
      %c0_18 = arith.constant 0 : index
      %c0_19 = arith.constant 0 : index
      %25 = vector.load %arg11[%c0_18, %c0_19] : memref<1x128xf32, #tpu.memory_space<vmem>>, vector<1x128xf32>
      tpu.vector_store %arg11[%c0_18, %c0_19], %24 {strides = array<i32>} : memref<1x128xf32, #tpu.memory_space<vmem>>, vector<1x128xf32>,
      %c0_20 = arith.constant 0 : index
      %c0_21 = arith.constant 0 : index
      %26 = vector.load %arg12[%c0_20, %c0_21] : memref<1x128xf32, #tpu.memory_space<vmem>>, vector<1x128xf32>
      %27 = arith.mulf %4, %4 : vector<512x128xf32>
      %cst_22 = arith.constant dense<0.000000e+00> : vector<1x128xf32>
      %28 = tpu.matmul %21, %27, %cst_22 {dimension_numbers = #tpu.dot_dimension_numbers<[1], [0], [0], [1], [0, 0, 1, 1], [], []>} : vector<1x512xf32>, vector<512x128xf32>, vector<1x128xf32> -> vector<1x128xf32>
      %29 = arith.addf %26, %28 : vector<1x128xf32>
      %c0_23 = arith.constant 0 : index
      %c0_24 = arith.constant 0 : index
      %30 = vector.load %arg12[%c0_23, %c0_24] : memref<1x128xf32, #tpu.memory_space<vmem>>, vector<1x128xf32>
      tpu.vector_store %arg12[%c0_23, %c0_24], %29 {strides = array<i32>} : memref<1x128xf32, #tpu.memory_space<vmem>>, vector<1x128xf32>,
    } else {
    }
    %c1_i32 = arith.constant 1 : i32
    %13 = arith.cmpi eq, %arg2, %c1_i32 : i32
    %c0_i32_10 = arith.constant 0 : i32
    %14 = arith.cmpi eq, %arg3, %c0_i32_10 : i32
    %15 = arith.andi %13, %14 : i1
    %16 = arith.extui %15 : i1 to i32
    %c0_i32_11 = arith.constant 0 : i32
    %17 = arith.cmpi ne, %16, %c0_i32_11 : i32
    scf.if %17 {
      %c0_14 = arith.constant 0 : index
      %c0_15 = arith.constant 0 : index
      %21 = vector.load %arg9[%c0_14, %c0_15] : memref<128x128xf32, #tpu.memory_space<vmem>>, vector<128x128xf32>
      %c0_16 = arith.constant 0 : index
      %c0_17 = arith.constant 0 : index
      %c0_18 = arith.constant 0 : index
      %22 = vector.load %arg6[%c0_16, %c0_17, %c0_18] : memref<1x1x128xf32, #tpu.memory_space<vmem>>, vector<1x1x128xf32>
      %23 = vector.shape_cast %22 : vector<1x1x128xf32> to vector<1x128xf32>
      %c0_19 = arith.constant 0 : index
      %c0_20 = arith.constant 0 : index
      %24 = vector.load %arg11[%c0_19, %c0_20] : memref<1x128xf32, #tpu.memory_space<vmem>>, vector<1x128xf32>
      %cst_21 = arith.constant 1.024000e+03 : f32
      %25 = vector.broadcast %cst_21 : f32 to vector<1x128xf32>
      %26 = arith.mulf %25, %23 : vector<1x128xf32>
      %27 = arith.addf %24, %26 : vector<1x128xf32>
      %c0_22 = arith.constant 0 : index
      %c0_23 = arith.constant 0 : index
      %28 = vector.load %arg12[%c0_22, %c0_23] : memref<1x128xf32, #tpu.memory_space<vmem>>, vector<1x128xf32>
      %cst_24 = arith.constant 2.000000e+00 : f32
      %29 = vector.broadcast %cst_24 : f32 to vector<1x128xf32>
      %30 = arith.mulf %29, %23 : vector<1x128xf32>
      %c0_25 = arith.constant 0 : index
      %c0_26 = arith.constant 0 : index
      %31 = vector.load %arg11[%c0_25, %c0_26] : memref<1x128xf32, #tpu.memory_space<vmem>>, vector<1x128xf32>
      %32 = arith.mulf %30, %31 : vector<1x128xf32>
      %33 = arith.addf %28, %32 : vector<1x128xf32>
      %cst_27 = arith.constant 1.024000e+03 : f32
      %34 = vector.broadcast %cst_27 : f32 to vector<1x128xf32>
      %35 = arith.mulf %34, %23 : vector<1x128xf32>
      %36 = arith.mulf %35, %23 : vector<1x128xf32>
      %37 = arith.addf %33, %36 : vector<1x128xf32>
      %cst_28 = arith.constant dense<0.000000e+00> : vector<1x128xf32>
      %38 = tpu.matmul %27, %21, %cst_28 {dimension_numbers = #tpu.dot_dimension_numbers<[1], [0], [0], [1], [0, 0, 1, 1], [], []>} : vector<1x128xf32>, vector<128x128xf32>, vector<1x128xf32> -> vector<1x128xf32>
      %cst_29 = arith.constant dense<0.000000e+00> : vector<1x128xf32>
      %39 = tpu.matmul %37, %21, %cst_29 {dimension_numbers = #tpu.dot_dimension_numbers<[1], [0], [0], [1], [0, 0, 1, 1], [], []>} : vector<1x128xf32>, vector<128x128xf32>, vector<1x128xf32> -> vector<1x128xf32>
      %cst_30 = arith.constant 4.8828125E-4 : f32
      %40 = vector.broadcast %cst_30 : f32 to vector<1x128xf32>
      %41 = arith.mulf %38, %40 : vector<1x128xf32>
      %cst_31 = arith.constant 4.8828125E-4 : f32
      %42 = vector.broadcast %cst_31 : f32 to vector<1x128xf32>
      %43 = arith.mulf %39, %42 : vector<1x128xf32>
      %44 = arith.mulf %41, %41 : vector<1x128xf32>
      %45 = arith.subf %43, %44 : vector<1x128xf32>
      %cst_32 = arith.constant 0.000000e+00 : f32
      %46 = vector.broadcast %cst_32 : f32 to vector<1x128xf32>
      %47 = arith.maximumf %45, %46 : vector<1x128xf32>
      %cst_33 = arith.constant 9.99999974E-6 : f32
      %48 = vector.broadcast %cst_33 : f32 to vector<1x128xf32>
      %49 = arith.addf %47, %48 : vector<1x128xf32>
      %50 = math.rsqrt %49 : vector<1x128xf32>
      %cst_34 = arith.constant dense<0.000000e+00> : vector<1x128xf32>
      %51 = tpu.matmul %41, %21, %cst_34 {dimension_numbers = #tpu.dot_dimension_numbers<[1], [1], [0], [0], [0, 0, 1, 0], [], []>} : vector<1x128xf32>, vector<128x128xf32>, vector<1x128xf32> -> vector<1x128xf32>
      %cst_35 = arith.constant dense<0.000000e+00> : vector<1x128xf32>
      %52 = tpu.matmul %50, %21, %cst_35 {dimension_numbers = #tpu.dot_dimension_numbers<[1], [1], [0], [0], [0, 0, 1, 0], [], []>} : vector<1x128xf32>, vector<128x128xf32>, vector<1x128xf32> -> vector<1x128xf32>
      %c0_36 = arith.constant 0 : index
      %c0_37 = arith.constant 0 : index
      %c0_38 = arith.constant 0 : index
      %53 = vector.load %arg7[%c0_36, %c0_37, %c0_38] : memref<1x1x128xf32, #tpu.memory_space<vmem>>, vector<1x1x128xf32>
      %54 = vector.shape_cast %53 : vector<1x1x128xf32> to vector<1x128xf32>
      %55 = arith.mulf %52, %54 : vector<1x128xf32>
      %c0_39 = arith.constant 0 : index
      %c0_40 = arith.constant 0 : index
      %56 = vector.load %arg13[%c0_39, %c0_40] : memref<1x128xf32, #tpu.memory_space<vmem>>, vector<1x128xf32>
      tpu.vector_store %arg13[%c0_39, %c0_40], %55 {strides = array<i32>} : memref<1x128xf32, #tpu.memory_space<vmem>>, vector<1x128xf32>,
      %c0_41 = arith.constant 0 : index
      %c0_42 = arith.constant 0 : index
      %c0_43 = arith.constant 0 : index
      %57 = vector.load %arg8[%c0_41, %c0_42, %c0_43] : memref<1x1x128xf32, #tpu.memory_space<vmem>>, vector<1x1x128xf32>
      %58 = vector.shape_cast %57 : vector<1x1x128xf32> to vector<1x128xf32>
      %59 = arith.subf %23, %51 : vector<1x128xf32>
      %60 = arith.mulf %59, %55 : vector<1x128xf32>
      %61 = arith.addf %58, %60 : vector<1x128xf32>
      %c0_44 = arith.constant 0 : index
      %c0_45 = arith.constant 0 : index
      %62 = vector.load %arg14[%c0_44, %c0_45] : memref<1x128xf32, #tpu.memory_space<vmem>>, vector<1x128xf32>
      tpu.vector_store %arg14[%c0_44, %c0_45], %61 {strides = array<i32>} : memref<1x128xf32, #tpu.memory_space<vmem>>, vector<1x128xf32>,
    } else {
    }
    %c1_i32_12 = arith.constant 1 : i32
    %18 = arith.cmpi eq, %arg2, %c1_i32_12 : i32
    %19 = arith.extui %18 : i1 to i32
    %c0_i32_13 = arith.constant 0 : i32
    %20 = arith.cmpi ne, %19, %c0_i32_13 : i32
    scf.if %20 {
      %c0_14 = arith.constant 0 : index
      %c0_15 = arith.constant 0 : index
      %21 = vector.load %arg13[%c0_14, %c0_15] : memref<1x128xf32, #tpu.memory_space<vmem>>, vector<1x128xf32>
      %22 = vector.broadcast %21 : vector<1x128xf32> to vector<512x128xf32>
      %23 = arith.mulf %4, %22 : vector<512x128xf32>
      %c0_16 = arith.constant 0 : index
      %c0_17 = arith.constant 0 : index
      %24 = vector.load %arg14[%c0_16, %c0_17] : memref<1x128xf32, #tpu.memory_space<vmem>>, vector<1x128xf32>
      %25 = vector.broadcast %24 : vector<1x128xf32> to vector<512x128xf32>
      %26 = arith.addf %23, %25 : vector<512x128xf32>
      %c0_18 = arith.constant 0 : index
      %c0_19 = arith.constant 0 : index
      %c0_20 = arith.constant 0 : index
      %c0_21 = arith.constant 0 : index
      %27 = vector.load %arg10[%c0_18, %c0_19, %c0_20, %c0_21] : memref<1x1x512x128xf32, #tpu.memory_space<vmem>>, vector<1x1x512x128xf32>
      %28 = vector.shape_cast %27 : vector<1x1x512x128xf32> to vector<512x128xf32>
      %29 = vector.shape_cast %26 : vector<512x128xf32> to vector<1x1x512x128xf32>
      tpu.vector_store %arg10[%c0_18, %c0_19, %c0_20, %c0_21], %29 {strides = array<i32>} : memref<1x1x512x128xf32, #tpu.memory_space<vmem>>, vector<1x1x512x128xf32>,
    } else {
    }
    return
  }
  func.func @transform_0(%arg0: i32, %arg1: i32, %arg2: i32, %arg3: i32) -> (i32, i32, i32, i32) {
    %c0_i32 = arith.constant 0 : i32
    %c0_i32_0 = arith.constant 0 : i32
    return %arg0, %arg1, %arg3, %c0_i32 : i32, i32, i32, i32
  }
  func.func @transform_1(%arg0: i32, %arg1: i32, %arg2: i32, %arg3: i32) -> (i32, i32, i32) {
    %c0_i32 = arith.constant 0 : i32
    %c0_i32_0 = arith.constant 0 : i32
    %c0_i32_1 = arith.constant 0 : i32
    return %arg0, %c0_i32, %c0_i32_0 : i32, i32, i32
  }
  func.func @transform_2(%arg0: i32, %arg1: i32, %arg2: i32, %arg3: i32) -> (i32, i32, i32) {
    %c0_i32 = arith.constant 0 : i32
    %c0_i32_0 = arith.constant 0 : i32
    %c0_i32_1 = arith.constant 0 : i32
    return %arg0, %c0_i32, %c0_i32_0 : i32, i32, i32
  }
  func.func @transform_3(%arg0: i32, %arg1: i32, %arg2: i32, %arg3: i32) -> (i32, i32, i32) {
    %c0_i32 = arith.constant 0 : i32
    %c0_i32_0 = arith.constant 0 : i32
    %c0_i32_1 = arith.constant 0 : i32
    return %arg0, %c0_i32, %c0_i32_0 : i32, i32, i32
  }
  func.func @transform_4(%arg0: i32, %arg1: i32, %arg2: i32, %arg3: i32) -> (i32, i32, i32) {
    %c0_i32 = arith.constant 0 : i32
    %c0_i32_0 = arith.constant 0 : i32
    %c0_i32_1 = arith.constant 0 : i32
    return %arg0, %c0_i32, %c0_i32_0 : i32, i32, i32
  }
  func.func @transform_5(%arg0: i32, %arg1: i32, %arg2: i32, %arg3: i32) -> (i32, i32) {
    %c0_i32 = arith.constant 0 : i32
    %c0_i32_0 = arith.constant 0 : i32
    %c0_i32_1 = arith.constant 0 : i32
    return %c0_i32, %c0_i32_0 : i32, i32
  }
  func.func @transform_6(%arg0: i32, %arg1: i32, %arg2: i32, %arg3: i32) -> (i32, i32, i32, i32) {
    %0 = arith.muli %arg2, %arg3 : i32
    %c0_i32 = arith.constant 0 : i32
    %c0_i32_0 = arith.constant 0 : i32
    return %arg0, %arg1, %0, %c0_i32 : i32, i32, i32, i32
  }
}

</mosaic_0001>

<bundles_post_ra>
// kernel: tpu_custom_call.1
= control target key start
LH: loop header
LB: loop body
LE: loop exit
PB: predicated region body
PF: predicated region fallthrough
CT: control target
= control target key end

     0   :  { %s4888_s0 = inlined_call_operand.hbm [shape: bf16[4,2,1024,128], index: 0, kind: input, shape index: {}]   ;;  %s4889_s1 = inlined_call_operand.hbm [shape: bf16[4,128,128], index: 1, kind: input, shape index: {}]   ;;  %s4890_s2 = inlined_call_operand.hbm [shape: f32[4,1,128], index: 2, kind: input, shape index: {}]   ;;  %s4891_s3 = inlined_call_operand.hbm [shape: f32[4,1,128], index: 3, kind: input, shape index: {}]   ;;  %s4892_s4 = inlined_call_operand.hbm [shape: f32[4,1,128], index: 4, kind: input, shape index: {}]   ;;  %s4893_s5 = inlined_call_operand.hbm [shape: f32[128,128], index: 5, kind: input, shape index: {}]   ;;  %s4894_s6 = inlined_call_operand.hbm [shape: f32[4,2,1024,128], index: 6, kind: output, shape index: {}]  }
   0x1   :  { %4973 = sst [smem:[#allocation77_spill]] %s4888_s0 }
   0x2   :  { %4974 = sst [smem:[#allocation78_spill]] %s4889_s1 }
   0x3   :  { %4975 = sst [smem:[#allocation79_spill]] %s4890_s2 }
   0x4   :  { %4976 = sst [smem:[#allocation80_spill]] %s4891_s3 }
   0x5   :  { %4977 = sst [smem:[#allocation81_spill]] %s4892_s4 }
   0x6   :  { %4978 = sst [smem:[#allocation82_spill]] %s4893_s5 }
   0x7   :  { %4979 = sst [smem:[#allocation83_spill]] %s4894_s6 }
   0x8   :  { %11 = vsyncpa [#allocation7], 0 }
   0x9   :  { %13 = vsyncpa [#allocation7 + $0x1], 0 }
   0xa   :  { %14 = vsyncpa [#allocation10], 0 }
   0xb   :  { %16 = vsyncpa [#allocation10 + $0x1], 0 }
   0xc   :  { %17 = vsyncpa [#allocation13], 0 }
   0xd   :  { %19 = vsyncpa [#allocation13 + $0x1], 0 }
   0xe   :  { %20 = vsyncpa [#allocation16], 0 }
   0xf   :  { %21 = vsyncpa [#allocation8], 0 }
  0x10   :  { %23 = vsyncpa [#allocation8 + $0x1], 0  ;;  %s3628_s21 = smov 0   ;;  %s3630_s22 = smov 0  }
  0x11   :  { %s3632_s23 = smov 0   ;;  %s3634_s24 = smov 0  }
  0x12   :  { %s3636_s25 = smov 0   ;;  %s3638_s26 = smov 0  }
  0x13   :  { %s3640_s27 = smov 0   ;;  %s3642_s28 = smov 0  }
  0x14   :  { %s3644_s29 = smov 0   ;;  %s3646_s30 = smov 0  }
  0x15   :  { %s3648_s7 = smov 0   ;;  %s3650_s8 = smov 0  }
  0x16   :  { %s3652_s9 = smov 0   ;;  %s3654_s10 = smov 0  }
  0x17   :  { %s3656_s11 = smov 0   ;;  %s3658_s12 = smov 0  }
  0x18   :  { %s3660_s13 = smov 0   ;;  %s3662_s14 = smov 0  }
  0x19 LB: > { %4980 = sst [smem:[#allocation23_spill]] %s3505_s21  ;;  %p4901_p0 = scmp.eq.s32.totalorder %s3573_s14, 0  ;;  %s3573_s14 = sphi %s3662_s14, %s29_s14   ;;  %s3569_s13 = sphi %s3660_s13, %s5177_s13   ;;  %s3565_s12 = sphi %s3658_s12, %s5176_s12   ;;  %s3561_s11 = sphi %s3656_s11, %s5175_s11   ;;  %s3557_s10 = sphi %s3654_s10, %s5174_s10   ;;  %s3553_s9 = sphi %s3652_s9, %s5164_s9   ;;  %s3549_s8 = sphi %s3650_s8, %s5163_s8   ;;  %s3545_s7 = sphi %s3648_s7, %s5162_s7   ;;  %s3541_s30 = sphi %s3646_s30, %s5161_s30   ;;  %s3537_s29 = sphi %s3644_s29, %s5173_s29   ;;  %s3533_s28 = sphi %s3642_s28, %s5172_s28   ;;  %s3529_s27 = sphi %s3640_s27, %s5160_s27   ;;  %s3525_s26 = sphi %s3638_s26, %s5171_s26   ;;  %s3521_s25 = sphi %s3636_s25, %s5159_s25   ;;  %s3517_s24 = sphi %s3634_s24, %s5158_s24   ;;  %s3513_s23 = sphi %s3632_s23, %s5170_s23   ;;  %s3509_s22 = sphi %s3630_s22, %s5169_s22   ;;  %s3505_s21 = sphi %s3628_s21, %s5157_s21  }
  0x1a   : > { %4981 = sst [smem:[#allocation24_spill]] %s3509_s22  ;;  %p99_p1 = scmp.ne.s32.totalorder %s3525_s26, %s3521_s25 }
  0x1b   : > { %4982 = sst [smem:[#allocation25_spill]] %s3521_s25  ;;  %p4900_p2 = scmp.lt.s32.totalorder %s3573_s14, 32 }
  0x1c   : > { %4983 = sst [smem:[#allocation26_spill]] %s3525_s26  ;;  %p101_p3 = por %p99_p1, %p4901_p0 }
  0x1d   : > { %4984 = sst [smem:[#allocation27_spill]] %s3533_s28  ;;  %s3728_s18 = sand.u32 1, %s3525_s26  }
  0x1e   : > { %4985 = sst [smem:[#allocation28_spill]] %s3541_s30  ;;  %s2192_s19 = sshll.u32 %s3728_s18, 6 }
  0x1f   : > { %4986 = sst [smem:[#allocation29_spill]] %s3545_s7  ;;  %s2254_s20 = sshll.u32 %s3569_s13, 10 }
  0x20   : > { %4987 = sst [smem:[#allocation30_spill]] %s3549_s8  ;;  %s4993_s1 = sld [smem:[#allocation78_spill]] }
  0x21   : > { %4988 = sst [smem:[#allocation31_spill]] %s3553_s9  ;;  %s302_s16 = scalar_lea.vmem [#allocation9], %s2192_s19 }
  0x22   : > { %4989 = sst [smem:[#allocation32_spill]] %s3557_s10  ;;  %s309_s15 = sshll.u32 %s302_s16, 4  ;;  %s3743_s15 = int_to_ptr.vmem [resolvable:$true] %s309_s15 }
  0x23   : > { %4990 = sst [smem:[#allocation33_spill]] %s3561_s11  ;;  %p3739_p4 = pnand %p4900_p2, %p101_p3 }
  0x24   : > { %4991 = sst [smem:[#allocation34_spill]] %s3565_s12  ;;  %s3746_s17 = sshll.u32 %s3569_s13, 4 }
  0x25   : > { %4992 = sst [smem:[#allocation35_spill]] %s3569_s13  ;;  %s4995_s7 = sand.u32 1, %s3573_s14  }
  0x26   : > { %s3735_s8 = scalar_lea.hbm %s4993_s1, %s2254_s20  ;;  %s3750_s6 = scalar_lea.sflag [#allocation10], %s4995_s7 }
  0x27   : > { %s4994_s30 = scalar_select %p3739_p4, 1, 0 }
  0x28   : > { %s3205_s9 = scalar_lea.hbm %s3735_s8, 1024  ;;  %p3756_p6 = pneg %p3739_p4 }
  0x29   : > { %p3206_p5 = scmp.ne.s32.totalorder %s3735_s8, %s3205_s9  ;;  %s3210_s4 = scalar_lea.hbm %s4993_s1, 4096 }
  0x2a   : > { %s4996_s20 = scalar_select %p3756_p6, 1, 0 }
  0x2b   : > { %p3208_p7 = pnand %p3756_p6, %p3206_p5  ;;  %p3211_p9 = scmp.lt.u32.totalorder %s3735_s8, %s4993_s1 }
  0x2c   : > { %p3212_p10 = scmp.lt.u32.totalorder %s3210_s4, %s3205_s9  ;;  %p3214_p12 = scmp.lt.u32.totalorder %s3205_s9, %s3735_s8 }
  0x2d   : > { %p3209_p8 = pneg %p3208_p7 }
  0x2e   : > { %p3213_p11 = por %p3212_p10, %p3211_p9 }
  0x30   : > { %p3215_p13 = por %p3214_p12, %p3213_p11 }
  0x32   : > { %p3216_p1 = pnand %p3215_p13, %p3209_p8 }
  0x34   : > { %3219 = shalt.err (!%p3216_p1)
}
  0x35   : > { %s3220_s7 = scalar_lea.vmem %s3743_s15, 1024  ;;  %s3575_s16 = smov [#allocation9]  }
  0x36   : > { %p3221_p3 = scmp.ne.s32.totalorder %s3743_s15, %s3220_s7  ;;  %s3225_s19 = sshll.u32 %s3575_s16, 4  ;;  %s3226_s19 = int_to_ptr.vmem [resolvable:$false] %s3225_s19 }
  0x37   : > { %s3227_s0 = scalar_lea.vmem %s3226_s19, 2048  ;;  %p3228_p2 = scmp.lt.s32.totalorder %s3743_s15, %s3226_s19 }
  0x38   : > { %p3223_p5 = pnand %p3221_p3, %p3756_p6  ;;  %p3229_p0 = scmp.lt.s32.totalorder %s3227_s0, %s3220_s7 }
  0x3a   : > { %p3224_p7 = pneg %p3223_p5  ;;  %p3230_p9 = por %p3229_p0, %p3228_p2 }
  0x3c   : > { %p3231_p10 = pnand %p3230_p9, %p3224_p7 }
  0x3e   : > { %3234 = shalt.err (!%p3231_p10)
}
  0x3f   : > { %s4906_s2 = smov 64   ;;  %s4907_s4 = smov 4  }
  0x40   : > { %2989 = dma.hbm_to_vmem [thread:$0]  (!%p3739_p4), %s3735_s8, 1024, %s3743_s15, %s3750_s6, %s4906_s2, %s4906_s2, %s4907_s4  }
  0x41   : > { %s4997_s3 = sld [smem:[#allocation80_spill]]  ;;  %s339_s19 = scalar_lea.vmem [#allocation12], %s3728_s18 }
  0x42   : > { %s346_s0 = sshll.u32 %s339_s19, 4  ;;  %s4998_s1 = sand.u32 1, %s3573_s14   ;;  %s347_s0 = int_to_ptr.vmem [resolvable:$true] %s346_s0 }
  0x43   : > { %s3792_s26 = scalar_lea.sflag [#allocation13], %s4998_s1 }
  0x47   : > { %s3787_s16 = scalar_lea.hbm %s4997_s3, %s3746_s17  ;;  %s3240_s9 = scalar_lea.hbm %s4997_s3, 64 }
  0x48   : > { %s3235_s13 = scalar_lea.hbm %s3787_s16, 16  ;;  %p3241_p11 = scmp.lt.u32.totalorder %s3787_s16, %s4997_s3 }
  0x49   : > { %p3236_p0 = scmp.ne.s32.totalorder %s3787_s16, %s3235_s13  ;;  %p3242_p12 = scmp.lt.u32.totalorder %s3240_s9, %s3235_s13 }
  0x4a   : > { %p3244_p1 = scmp.lt.u32.totalorder %s3235_s13, %s3787_s16 }
  0x4b   : > { %p3238_p2 = pnand %p3236_p0, %p3756_p6  ;;  %p3243_p13 = por %p3242_p12, %p3241_p11 }
  0x4d   : > { %p3239_p8 = pneg %p3238_p2  ;;  %p3245_p3 = por %p3244_p1, %p3243_p13 }
  0x4f   : > { %p3246_p5 = pnand %p3245_p3, %p3239_p8 }
  0x51   : > { %3249 = shalt.err (!%p3246_p5)
}
  0x52   : > { %s3250_s1 = scalar_lea.vmem %s347_s0, 16  ;;  %s3578_s19 = smov [#allocation12]  }
  0x53   : > { %p3251_p7 = scmp.ne.s32.totalorder %s347_s0, %s3250_s1  ;;  %s3255_s4 = sshll.u32 %s3578_s19, 4  ;;  %s3256_s4 = int_to_ptr.vmem [resolvable:$false] %s3255_s4 }
  0x54   : > { %s3257_s8 = scalar_lea.vmem %s3256_s4, 32  ;;  %p3258_p0 = scmp.lt.s32.totalorder %s347_s0, %s3256_s4 }
  0x55   : > { %p3253_p9 = pnand %p3251_p7, %p3756_p6  ;;  %p3259_p2 = scmp.lt.s32.totalorder %s3257_s8, %s3250_s1 }
  0x57   : > { %p3254_p10 = pneg %p3253_p9  ;;  %p3260_p4 = por %p3259_p2, %p3258_p0 }
  0x59   : > { %p3261_p11 = pnand %p3260_p4, %p3254_p10 }
  0x5b   : > { %3264 = shalt.err (!%p3261_p11)
}
  0x5c   : > { %p4999_p12 = scmp.ne.s32.totalorder %s4994_s30, 0  ;;  %s3813_s13 = sadd.s32 4294967295, %s3573_s14  }
  0x5d   : > { %5000 = sst [smem:[#allocation36_spill]] %s3813_s13  ;;  %s2183_s2 = sadd.s32 4294967294, %s3573_s14  }
  0x5e   : > { %2995 = dma.hbm_to_vmem [thread:$0]  (!%p4999_p12), %s3787_s16, 16, %s347_s0, %s3792_s26  }
  0x5f   : > { %p79_p4 = scmp.ne.s32.totalorder %s3533_s28, %s3529_s27  ;;  %p4913_p8 = scmp.eq.s32.totalorder %s3813_s13, 0 }
  0x60   : > { %p105_p13 = scmp.ne.s32.totalorder %s3521_s25, %s3517_s24  ;;  %p233_p3 = scmp.ne.s32.totalorder %s3513_s23, %s3509_s22 }
  0x61   : > { %p3824_p1 = por %p4913_p8, %p79_p4  ;;  %p234_p7 = scmp.eq.s32.totalorder %s3813_s13, 31 }
  0x62   : > { %p3832_p5 = por %p105_p13, %p4913_p8  ;;  %p239_p9 = scmp.ne.s32.totalorder %s3509_s22, %s3505_s21 }
  0x63   : > { %s5001_s15 = scalar_select %p3824_p1, 1, 0 }
  0x64   : > { %s5003_s16 = scalar_select %p3832_p5, 1, 0 }
  0x65   : > { %5002 = sst [smem:[#allocation37_spill]] %s5001_s15  ;;  %p240_p10 = scmp.eq.s32.totalorder %s2183_s2, 31 }
  0x66   : > { %5004 = sst [smem:[#allocation38_spill]] %s5003_s16  ;;  %p3839_p0 = por %p234_p7, %p233_p3 }
  0x67   : > { %p2184_p2 = scmp.ge.s32.totalorder %s3573_s14, 1  ;;  %p3844_p11 = por %p240_p10, %p239_p9 }
  0x68   : > { %s5005_s27 = scalar_select %p3839_p0, 1, 0 }
  0x69   : > { %s5007_s24 = scalar_select %p3844_p11, 1, 0 }
  0x6a   : > { %5006 = sst [smem:[#allocation39_spill]] %s5005_s27  ;;  %p247_p4 = scmp.lt.s32.totalorder %s3573_s14, 33 }
  0x6b   : > { %5008 = sst [smem:[#allocation40_spill]] %s5007_s24  ;;  %s3579_s9 = smov [#allocation15]  }
  0x6c   : > { %p3849_p1 = pnand %p2184_p2, %p247_p4  ;;  %s259_s7 = sshll.u32 %s3579_s9, 4  ;;  %s260_s7 = int_to_ptr.vmem [resolvable:$true] %s259_s7 }
  0x6d   : > { %s5012_s5 = sld [smem:[#allocation82_spill]] }
  0x6e   : > { %s5009_s0 = scalar_select %p3849_p1, 1, 0 }
  0x6f   : > { %p2979_p13 = pneg %p3849_p1 }
  0x70   : > { %5010 = sst [smem:[#allocation41_spill]] %s5009_s0 }
  0x71   : > { %p3857_p3 = pnand %p2979_p13, %p4913_p8 }
  0x73   : > { %s3265_s2 = scalar_lea.hbm %s5012_s5, 2048  ;;  %p3267_p9 = pneg %p3857_p3 }
  0x74   : > { %p3266_p7 = scmp.ne.s32.totalorder %s5012_s5, %s3265_s2  ;;  %p3272_p4 = scmp.lt.u32.totalorder %s3265_s2, %s5012_s5 }
  0x76   : > { %p3268_p10 = pnand %p3267_p9, %p3266_p7 }
  0x78   : > { %p3269_p2 = pneg %p3268_p10 }
  0x7a   : > { %p3274_p13 = pnand %p3272_p4, %p3269_p2 }
  0x7c   : > { %3277 = shalt.err (!%p3274_p13)
}
  0x7d   : > { %s3278_s21 = scalar_lea.vmem %s260_s7, 2048  ;;  %p3286_p5 = scmp.lt.s32.totalorder %s260_s7, %s260_s7 }
  0x7e   : > { %p3279_p8 = scmp.ne.s32.totalorder %s260_s7, %s3278_s21  ;;  %p3287_p1 = scmp.lt.s32.totalorder %s3278_s21, %s3278_s21 }
  0x80   : > { %p3281_p11 = pnand %p3279_p8, %p3267_p9  ;;  %p3288_p12 = por %p3287_p1, %p3286_p5 }
  0x82   : > { %p3282_p0 = pneg %p3281_p11 }
  0x84   : > { %p3289_p6 = pnand %p3288_p12, %p3282_p0 }
  0x86   : > { %3292 = shalt.err (!%p3289_p6)
}
  0x87   : > { %s3580_s3 = smov 128   ;;  %s3581_s4 = smov 8  }
  0x88   : > { %2982 = dma.hbm_to_vmem [thread:$0]  (!%p3857_p3), %s5012_s5, 2048, %s260_s7, [#allocation16], %s3580_s3, %s3580_s3, %s3581_s4  }
  0x89   : > { %s44_s19 = sadd.s32 1, %s3557_s10  ;;  %s47_s8 = sadd.s32 1, %s3561_s11 }
  0x8a   : > { %p45_p6 = scmp.ge.s32.totalorder %s44_s19, 2  ;;  %s51_s2 = sadd.s32 1, %s3565_s12 }
  0x8b   : > { %p73_p12 = scmp.ne.s32.totalorder %s3537_s29, %s3533_s28  ;;  %s5013_s27 = sld [smem:[#allocation35_spill]] }
  0x8c   : > { %s5179_s19 = smov (%p45_p6, %s44_s19), 0  ;;  %s5181_s8 = smov (!%p45_p6, %s47_s8), %s3561_s11 }
  0x8d   : > { %5014 = sst [smem:[#allocation42_spill]] %s5179_s19  ;;  %s62_s1 = ssub.s32 %s3557_s10, %s5179_s19 }
  0x8e   : > { %p5015_p8 = scmp.eq.s32.totalorder %s3573_s14, 0  ;;  %p49_p5 = scmp.ge.s32.totalorder %s5181_s8, 2 }
  0x8f   : > { %s214_s3 = smul.u32 %s3557_s10, %s3561_s11  ;;  %s4932_s4 = sand.u32 1, %s3537_s29  }
  0x90   : > { %p3890_p1 = por %p5015_p8, %p73_p12  ;;  %s2188_s21 = sshll.u32 %s3557_s10, 6 }
  0x91   : > { %s5183_s8 = smov (%p49_p5, %s5181_s8), 0  ;;  %s5185_s2 = smov (!%p49_p5, %s51_s2), %s3565_s12 }
  0x92   : > { %5017 = sst [smem:[#allocation43_spill]] %s5183_s8  ;;  %s215_s24 = smul.u32 %s5183_s8, %s5179_s19 }
  0x93   : > { %p53_p0 = scmp.ge.s32.totalorder %s5185_s2, 2  ;;  %s2187_s9 = sshll.u32 %s4932_s4, 8 }
  0x94   : > { %s219_s5 = ssub.s32 %s214_s3, %s215_s24  ;;  %s5019_s22 = sadd.s32 1, %s5013_s27 }
  0x95   : > { %s5187_s2 = smov (%p53_p0, %s5185_s2), 0  ;;  %s5189_s22 = smov (!%p53_p0, %s5019_s22), %s5013_s27 }
  0x96   : > { %5018 = sst [smem:[#allocation44_spill]] %s5187_s2  ;;  %s60_s16 = ssub.s32 %s3565_s12, %s5187_s2 }
  0x97   : > { %s2189_s25 = sshll.u32 %s3565_s12, 7  ;;  %p57_p11 = scmp.ge.s32.totalorder %s5189_s22, 4 }
  0x98   : > { %s5020_s11 = sld [smem:[#allocation26_spill]]  ;;  %s283_s10 = sadd.s32 %s2189_s25, %s2188_s21 }
  0x99   : > { %s2190_s13 = sshll.u32 %s5013_s27, 8  ;;  %s277_s8 = scalar_lea.vmem [#allocation6], %s2187_s9 }
  0x9a   : > { %s288_s19 = sshll.u32 %s277_s8, 4  ;;  %s5191_s22 = smov (%p57_p11, %s5189_s22), 0  ;;  %s3916_s19 = int_to_ptr.vmem [resolvable:$true] %s288_s19 }
  0x9b   : > { %5021 = sst [smem:[#allocation45_spill]] %s5191_s22  ;;  %s285_s3 = sadd.s32 %s2190_s13, %s283_s10 }
  0x9c   : > { %s59_s24 = ssub.s32 %s5013_s27, %s5191_s22  ;;  %s2191_s25 = sshll.u32 %s285_s3, 6 }
  0x9d   : > { %s61_s21 = sor.u32 %s60_s16, %s59_s24  ;;  %p90_p3 = scmp.eq.s32.totalorder %s59_s24, 0 }
  0x9e   : > { %s63_s4 = sor.u32 %s62_s1, %s61_s21  ;;  %s220_s2 = sor.u32 %s219_s5, %s61_s21 }
  0x9f   : > { %p64_p7 = scmp.eq.s32.totalorder %s63_s4, 0  ;;  %p221_p9 = scmp.eq.s32.totalorder %s220_s2, 0 }
  0xa0   : > { %s5022_s8 = sadd.s32 1, %s5020_s11  ;;  %s5023_s9 = sadd.s32 1, %s3537_s29 }
  0xa1   : > { %s5193_s11 = smov (!%p90_p3, %s5020_s11), %s5022_s8  ;;  %s5024_s15 = sadd.s32 1, %s3513_s23 }
  0xa2   : > { %s3928_s12 = scalar_select %p64_p7, %s3537_s29, %s5023_s9  }
  0xa3   : > { %s3933_s10 = scalar_select %p221_p9, %s3513_s23, %s5024_s15  }
  0xa4   : > { %s5025_s27 = sld [smem:[#allocation77_spill]]  ;;  %p5027_p10 = scmp.lt.s32.totalorder %s3573_s14, 32 }
  0xa5   : > { %s5029_s1 = sld [smem:[#allocation79_spill]]  ;;  %s322_s28 = scalar_lea.vmem [#allocation11], %s3728_s18 }
  0xa6   : > { %p3944_p2 = pnand %p5027_p10, %p3890_p1  ;;  %s3955_s4 = sshll.u32 %s322_s28, 4  ;;  %s330_s4 = int_to_ptr.vmem [resolvable:$true] %s3955_s4 }
  0xa7   : > { %s5030_s7 = sand.u32 1, %s3537_s29  }
  0xa8   : > { %s3959_s3 = scalar_lea.sflag [#allocation7], %s5030_s7  ;;  %p3295_p13 = pneg %p3944_p2 }
  0xaa   : > { %s5026_s0 = smov %s5025_s27  ;;  %s3938_s22 = scalar_lea.hbm %s5025_s27, %s2191_s25 }
  0xab   : > { %s3952_s15 = scalar_lea.hbm %s5029_s1, %s3746_s17  ;;  %s3293_s24 = scalar_lea.hbm %s3938_s22, 4096 }
  0xac   : > { %p3294_p4 = scmp.ne.s32.totalorder %s3938_s22, %s3293_s24  ;;  %s3298_s8 = scalar_lea.hbm %s5026_s0, 65536 }
  0xad   : > { %p3299_p8 = scmp.lt.u32.totalorder %s3938_s22, %s5026_s0  ;;  %p3300_p1 = scmp.lt.u32.totalorder %s3298_s8, %s3293_s24 }
  0xae   : > { %p3296_p6 = pnand %p3295_p13, %p3294_p4  ;;  %p3302_p0 = scmp.lt.u32.totalorder %s3293_s24, %s3938_s22 }
  0xaf   : > { %p3301_p5 = por %p3300_p1, %p3299_p8 }
  0xb0   : > { %p3297_p12 = pneg %p3296_p6 }
  0xb1   : > { %p3303_p11 = por %p3302_p0, %p3301_p5 }
  0xb3   : > { %p3304_p3 = pnand %p3303_p11, %p3297_p12 }
  0xb5   : > { %3307 = shalt.err (!%p3304_p3)
}
  0xb6   : > { %s3308_s27 = scalar_lea.vmem %s3916_s19, 4096  ;;  %s3582_s16 = smov [#allocation6]  }
  0xb7   : > { %p3309_p7 = scmp.ne.s32.totalorder %s3916_s19, %s3308_s27  ;;  %s3313_s2 = sshll.u32 %s3582_s16, 4  ;;  %s3314_s2 = int_to_ptr.vmem [resolvable:$false] %s3313_s2 }
  0xb8   : > { %s3315_s28 = scalar_lea.vmem %s3314_s2, 8192  ;;  %p3316_p4 = scmp.lt.s32.totalorder %s3916_s19, %s3314_s2 }
  0xb9   : > { %p3311_p9 = pnand %p3309_p7, %p3295_p13  ;;  %p3317_p6 = scmp.lt.s32.totalorder %s3315_s28, %s3308_s27 }
  0xbb   : > { %p3312_p10 = pneg %p3311_p9  ;;  %p3318_p8 = por %p3317_p6, %p3316_p4 }
  0xbd   : > { %p3319_p1 = pnand %p3318_p8, %p3312_p10 }
  0xbf   : > { %3322 = shalt.err (!%p3319_p1)
}
  0xc0   : > { %s5031_s7 = smov 4   ;;  %s5032_s24 = smov 64  }
  0xc1   : > { %2986 = dma.hbm_to_vmem [thread:$0]  (!%p3944_p2), %s3938_s22, 4096, %s3916_s19, %s3959_s3, %s5032_s24, %s5032_s24, %s5031_s7  }
  0xc2   : > { %s3323_s25 = scalar_lea.hbm %s3952_s15, 16  ;;  %p5033_p12 = scmp.ne.s32.totalorder %s4996_s20, 0 }
  0xc3   : > { %p3324_p13 = scmp.ne.s32.totalorder %s3952_s15, %s3323_s25  ;;  %s3328_s8 = scalar_lea.hbm %s5029_s1, 64 }
  0xc4   : > { %p3329_p11 = scmp.lt.u32.totalorder %s3952_s15, %s5029_s1  ;;  %p3330_p3 = scmp.lt.u32.totalorder %s3328_s8, %s3323_s25 }
  0xc5   : > { %p3326_p5 = pnand %p3324_p13, %p5033_p12  ;;  %p3332_p9 = scmp.lt.u32.totalorder %s3323_s25, %s3952_s15 }
  0xc6   : > { %p3331_p7 = por %p3330_p3, %p3329_p11 }
  0xc7   : > { %p3327_p0 = pneg %p3326_p5 }
  0xc8   : > { %p3333_p10 = por %p3332_p9, %p3331_p7 }
  0xca   : > { %p3334_p4 = pnand %p3333_p10, %p3327_p0 }
  0xcc   : > { %3337 = shalt.err (!%p3334_p4)
}
  0xcd   : > { %s3338_s22 = scalar_lea.vmem %s330_s4, 16  ;;  %s3583_s19 = smov [#allocation11]  }
  0xce   : > { %p3339_p2 = scmp.ne.s32.totalorder %s330_s4, %s3338_s22  ;;  %s3343_s3 = sshll.u32 %s3583_s19, 4  ;;  %s3344_s3 = int_to_ptr.vmem [resolvable:$false] %s3343_s3 }
  0xcf   : > { %s3345_s27 = scalar_lea.vmem %s3344_s3, 32  ;;  %p3346_p1 = scmp.lt.s32.totalorder %s330_s4, %s3344_s3 }
  0xd0   : > { %p3341_p6 = pnand %p3339_p2, %p5033_p12  ;;  %p3347_p13 = scmp.lt.s32.totalorder %s3345_s27, %s3338_s22 }
  0xd2   : > { %p3342_p8 = pneg %p3341_p6  ;;  %p3348_p5 = por %p3347_p13, %p3346_p1 }
  0xd4   : > { %p3349_p3 = pnand %p3348_p5, %p3342_p8 }
  0xd6   : > { %3352 = shalt.err (!%p3349_p3)
}
  0xd7   : > { %p5034_p11 = scmp.ne.s32.totalorder %s4994_s30, 0  ;;  %s5035_s28 = sld [smem:[#allocation81_spill]] }
  0xd8   : > { %s356_s24 = scalar_lea.vmem [#allocation14], %s3728_s18 }
  0xd9   : > { %2992 = dma.hbm_to_vmem [thread:$0]  (!%p5034_p11), %s3952_s15, 16, %s330_s4, %s3750_s6  }
  0xda   : > { %s363_s25 = sshll.u32 %s356_s24, 4  ;;  %s364_s25 = int_to_ptr.vmem [resolvable:$true] %s363_s25 }
  0xdd   : > { %s5036_s5 = smov %s5035_s28  ;;  %s4013_s7 = scalar_lea.hbm %s5035_s28, %s3746_s17 }
  0xde   : > { %s3353_s21 = scalar_lea.hbm %s4013_s7, 16  ;;  %s3358_s6 = scalar_lea.hbm %s5036_s5, 64 }
  0xdf   : > { %p3354_p0 = scmp.ne.s32.totalorder %s4013_s7, %s3353_s21  ;;  %p3359_p10 = scmp.lt.u32.totalorder %s4013_s7, %s5036_s5 }
  0xe0   : > { %p3360_p4 = scmp.lt.u32.totalorder %s3358_s6, %s3353_s21  ;;  %p3362_p6 = scmp.lt.u32.totalorder %s3353_s21, %s4013_s7 }
  0xe1   : > { %p3356_p7 = pnand %p3354_p0, %p5033_p12 }
  0xe2   : > { %p3361_p2 = por %p3360_p4, %p3359_p10 }
  0xe3   : > { %p3357_p9 = pneg %p3356_p7 }
  0xe4   : > { %p3363_p8 = por %p3362_p6, %p3361_p2 }
  0xe6   : > { %p3364_p1 = pnand %p3363_p8, %p3357_p9 }
  0xe8   : > { %3367 = shalt.err (!%p3364_p1)
}
  0xe9   : > { %s3368_s17 = scalar_lea.vmem %s364_s25, 16  ;;  %s3584_s18 = smov [#allocation14]  }
  0xea   : > { %p3369_p13 = scmp.ne.s32.totalorder %s364_s25, %s3368_s17  ;;  %s3373_s13 = sshll.u32 %s3584_s18, 4  ;;  %s3374_s13 = int_to_ptr.vmem [resolvable:$false] %s3373_s13 }
  0xeb   : > { %s3375_s22 = scalar_lea.vmem %s3374_s13, 32  ;;  %p3376_p0 = scmp.lt.s32.totalorder %s364_s25, %s3374_s13 }
  0xec   : > { %p3371_p5 = pnand %p3369_p13, %p5033_p12  ;;  %p3377_p7 = scmp.lt.s32.totalorder %s3375_s22, %s3368_s17 }
  0xee   : > { %p3372_p3 = pneg %p3371_p5  ;;  %p3378_p11 = por %p3377_p7, %p3376_p0 }
  0xf0   : > { %p3379_p4 = pnand %p3378_p11, %p3372_p3 }
  0xf2   : > { %3382 = shalt.err (!%p3379_p4)
}
  0xf3   : > { %p5037_p10 = scmp.ne.s32.totalorder %s4994_s30, 0  ;;  %s5038_s19 = sld [smem:[#allocation41_spill]] }
  0xf5   : > { %2998 = dma.hbm_to_vmem [thread:$0]  (!%p5037_p10), %s4013_s7, 16, %s364_s25, %s3792_s26  }
  0xf9   : > { %p5039_p9 = scmp.ne.s32.totalorder %s5038_s19, 0 }
  0xfb   : > { %372 = sbr.rel (%p5039_p9) target bundleno = 1461 (0x5b5), region = 44 }
 0x102   : > { %s5040_s20 = sld [smem:[#allocation27_spill]]  ;;  %s5041_s3 = sld [smem:[#allocation37_spill]] }
 0x108   : > { %s374_s27 = sand.u32 1, %s5040_s20   ;;  %p5042_p12 = scmp.ne.s32.totalorder %s5041_s3, 0 }
 0x109   : > { %s2199_s16 = sshll.u32 %s374_s27, 8  ;;  %s375_s2 = scalar_lea.sflag [#allocation7], %s374_s27 }
 0x10a   : > { %s4037_s28 = scalar_lea.vmem [#allocation6], %s2199_s16 }
 0x10b   : > { %3484 = dma.done.wait (%p5042_p12), %s375_s2, 4096  }
 0x10c   : > { %3486 = vsyncadd (%p5042_p12), %s375_s2, 4294963200  ;;  %s5043_s24 = sld [smem:[#allocation36_spill]]  ;;  %s5045_s21 = sld [smem:[#allocation38_spill]] }
 0x10d   : > { %s5044_s30 = sld [smem:[#allocation25_spill]] }
 0x112   : > { %s383_s8 = sand.u32 1, %s5043_s24   ;;  %p5046_p11 = scmp.ne.s32.totalorder %s5045_s21, 0 }
 0x113   : > { %s4045_s26 = sand.u32 1, %s5044_s30   ;;  %s384_s25 = scalar_lea.sflag [#allocation10], %s383_s8 }
 0x114   : > { %s2200_s7 = sshll.u32 %s4045_s26, 6 }
 0x115   : > { %s4048_s9 = scalar_lea.vmem [#allocation9], %s2200_s7 }
 0x116   : > { %3488 = dma.done.wait (%p5046_p11), %s384_s25, 1040  }
 0x117   : > { %3490 = vsyncadd (%p5046_p11), %s384_s25, 4294966256  ;;  %s395_s6 = scalar_lea.vmem [#allocation11], %s4045_s26  ;;  %s401_s15 = scalar_lea.sflag [#allocation13], %s383_s8 }
 0x118   : > { %s403_s4 = scalar_lea.vmem [#allocation12], %s4045_s26 }
 0x119   : > { %3492 = dma.done.wait (%p5046_p11), %s401_s15, 32  }
 0x11a   : > { %3494 = vsyncadd (%p5046_p11), %s401_s15, 4294967264  ;;  %s411_s17 = scalar_lea.vmem [#allocation14], %s4045_s26  ;;  %p5047_p2 = scmp.eq.s32.totalorder %s5043_s24, 0 }
 0x11c   : > { %3496 = dma.done.wait (%p5047_p2), [#allocation16], 2048   ;;  %p5048_p6 = pmov %p5047_p2 }
 0x11d   : > { %s5049_s18 = sld [smem:[#allocation24_spill]]  ;;  %v3163_v0 = vld [vmem:[%s4048_s9] sm:$0xff]   ;;  %v3164_v1 = vld [vmem:[%s4048_s9 + $0x8] sm:$0xff]   ;;  %v3165_v2 = vld [vmem:[%s4048_s9 + $0x10] sm:$0xff]   ;;  %s5050_s19 = sld [smem:[#allocation29_spill]] }
 0x11e   : > { %3498 = vsyncadd (%p5048_p6), [#allocation16], 4294965248  ;;  %2503 = vmatprep.subr.bf16.mxu0 %v3163_v0  ;;  %2947 = vmatprep.subr.bf16.mxu1 %v3163_v0  ;;  %v3166_v3 = vld [vmem:[%s4048_s9 + $0x18] sm:$0xff]   ;;  %v3171_v4 = vld [vmem:[%s4037_s28] sm:$0xff]   ;;  %s5051_s20 = sld [smem:[#allocation28_spill]] }
 0x11f   : > { %2504 = vmatpush3.bf16.msra.mxu0 %v3163_v0  ;;  %2955 = vmatpush3.bf16.msra.mxu1 %v3163_v0  ;;  %v3172_v5 = vld [vmem:[%s4037_s28 + $0x80] sm:$0xff]   ;;  %v3168_v7 = vld [vmem:[%s4048_s9 + $0x28] sm:$0xff]   ;;  %v3169_v8 = vld [vmem:[%s4048_s9 + $0x30] sm:$0xff]  }
 0x120   : > { %2505 = vmatprep.subr.bf16.mxu0 %v3164_v1  ;;  %2948 = vmatprep.subr.bf16.mxu1 %v3164_v1  ;;  %v3167_v6 = vld [vmem:[%s4048_s9 + $0x20] sm:$0xff]   ;;  %v3170_v9 = vld [vmem:[%s4048_s9 + $0x38] sm:$0xff]   ;;  %v3173_v10 = vld [vmem:[%s4037_s28 + $0x8] sm:$0xff]  }
 0x121   : > { %2519 = vmatprep.mubr.bf16.mxu0 %v3171_v4  ;;  %2551 = vmatprep.mubr.bf16.mxu1 %v3172_v5  ;;  %v3174_v11 = vld [vmem:[%s4037_s28 + $0x88] sm:$0xff]   ;;  %v3175_v12 = vld [vmem:[%s4037_s28 + $0x10] sm:$0xff]   ;;  %v3177_v14 = vld [vmem:[%s4037_s28 + $0x18] sm:$0xff]  }
 0x122   : > { %v3176_v13 = vld [vmem:[%s4037_s28 + $0x90] sm:$0xff]   ;;  %v3178_v15 = vld [vmem:[%s4037_s28 + $0x98] sm:$0xff]   ;;  %v3179_v16 = vld [vmem:[%s4037_s28 + $0x20] sm:$0xff]  }
 0x123   : > { %s458_s13 = sand.u32 1, %s5049_s18   ;;  %2506 = vmatpush3.bf16.msra.mxu0 %v3164_v1  ;;  %2956 = vmatpush3.bf16.msra.mxu1 %v3164_v1  ;;  %v3180_v17 = vld [vmem:[%s4037_s28 + $0xa0] sm:$0xff]   ;;  %v3181_v18 = vld [vmem:[%s4037_s28 + $0x28] sm:$0xff]   ;;  %v3183_v20 = vld [vmem:[%s4037_s28 + $0x30] sm:$0xff]   ;;  %p1074_p8 = scmp.eq.s32.totalorder %s5050_s19, 0 }
 0x124   : > { %s4068_s22 = sshll.u32 %s458_s13, 9  ;;  %2507 = vmatprep.subr.bf16.mxu0 %v3165_v2  ;;  %2949 = vmatprep.subr.bf16.mxu1 %v3165_v2  ;;  %v3182_v19 = vld [vmem:[%s4037_s28 + $0xa8] sm:$0xff]   ;;  %v3184_v21 = vld [vmem:[%s4037_s28 + $0xb0] sm:$0xff]   ;;  %v3185_v22 = vld [vmem:[%s4037_s28 + $0x38] sm:$0xff]   ;;  %p1075_p1 = scmp.eq.s32.totalorder %s5051_s20, 0 }
 0x125   : > { %v3186_v23 = vld [vmem:[%s4037_s28 + $0xb8] sm:$0xff]   ;;  %v3187_v24 = vld [vmem:[%s4037_s28 + $0x40] sm:$0xff]   ;;  %v3189_v26 = vld [vmem:[%s4037_s28 + $0x48] sm:$0xff]   ;;  %s4247_s27 = scalar_lea.vmem [#allocation17], %s4068_s22 }
 0x126   : > { %v3188_v25 = vld [vmem:[%s4037_s28 + $0xc0] sm:$0xff]   ;;  %v3190_v27 = vld [vmem:[%s4037_s28 + $0xc8] sm:$0xff]   ;;  %v3191_v28 = vld [vmem:[%s4037_s28 + $0x50] sm:$0xff]   ;;  %p4114_p13 = pnand %p1075_p1, %p1074_p8 }
 0x127   : > { %2508 = vmatpush3.bf16.msra.mxu0 %v3165_v2  ;;  %2957 = vmatpush3.bf16.msra.mxu1 %v3165_v2  ;;  %v3192_v29 = vld [vmem:[%s4037_s28 + $0xd0] sm:$0xff]   ;;  %v3193_v30 = vld [vmem:[%s4037_s28 + $0x58] sm:$0xff]   ;;  %v3195_v32 = vld [vmem:[%s4037_s28 + $0x60] sm:$0xff]  }
 0x128   : > { %2509 = vmatprep.subr.bf16.mxu0 %v3166_v3  ;;  %2950 = vmatprep.subr.bf16.mxu1 %v3166_v3  ;;  %v3194_v31 = vld [vmem:[%s4037_s28 + $0xd8] sm:$0xff]   ;;  %v3196_v33 = vld [vmem:[%s4037_s28 + $0xe0] sm:$0xff]   ;;  %v3197_v34 = vld [vmem:[%s4037_s28 + $0x68] sm:$0xff]  }
 0x129   : > { %v3198_v35 = vld [vmem:[%s4037_s28 + $0xe8] sm:$0xff]   ;;  %v3199_v36 = vld [vmem:[%s4037_s28 + $0x70] sm:$0xff]   ;;  %v3201_v38 = vld [vmem:[%s4037_s28 + $0x78] sm:$0xff]  }
 0x12a   : > { %v3200_v37 = vld [vmem:[%s4037_s28 + $0xf0] sm:$0xff]   ;;  %v3202_v39 = vld [vmem:[%s4037_s28 + $0xf8] sm:$0xff]  }
 0x12b   : > { %2510 = vmatpush3.bf16.msra.mxu0 %v3166_v3  ;;  %2958 = vmatpush3.bf16.msra.mxu1 %v3166_v3 }
 0x12c   : > { %2511 = vmatprep.subr.bf16.mxu0 %v3167_v6  ;;  %2951 = vmatprep.subr.bf16.mxu1 %v3167_v6 }
 0x12f   : > { %2512 = vmatpush3.bf16.msra.mxu0 %v3167_v6  ;;  %2959 = vmatpush3.bf16.msra.mxu1 %v3167_v6 }
 0x130   : > { %2513 = vmatprep.subr.bf16.mxu0 %v3168_v7  ;;  %2952 = vmatprep.subr.bf16.mxu1 %v3168_v7 }
 0x133   : > { %2514 = vmatpush3.bf16.msra.mxu0 %v3168_v7  ;;  %2960 = vmatpush3.bf16.msra.mxu1 %v3168_v7 }
 0x134   : > { %2515 = vmatprep.subr.bf16.mxu0 %v3169_v8  ;;  %2953 = vmatprep.subr.bf16.mxu1 %v3169_v8 }
 0x137   : > { %2516 = vmatpush3.bf16.msra.mxu0 %v3169_v8  ;;  %2961 = vmatpush3.bf16.msra.mxu1 %v3169_v8 }
 0x138   : > { %2517 = vmatprep.subr.bf16.mxu0 %v3170_v9  ;;  %2954 = vmatprep.subr.bf16.mxu1 %v3170_v9 }
 0x13b   : > { %2518 = vmatpush3.bf16.msra.mxu0 %v3170_v9  ;;  %2962 = vmatpush3.bf16.msra.mxu1 %v3170_v9 }
 0x13e   : > { %2520 = vmatmul.mubr.bf16.vlgmr.msra.gmra.mrb[0].mxu0 %v3173_v10  ;;  %2552 = vmatmul.mubr.bf16.vlgmr.msra.gmra.mrb[0].mxu1 %v3174_v11 }
 0x13f   : > { %2523 = vmatprep.mubr.bf16.mxu0 %v3175_v12  ;;  %2555 = vmatprep.mubr.bf16.mxu1 %v3176_v13 }
 0x146   : > { %2524 = vmatmul.mubr.bf16.gmra.mrb[4].mxu0 %v3177_v14  ;;  %2556 = vmatmul.mubr.bf16.gmra.mrb[4].mxu1 %v3178_v15 }
 0x147   : > { %2527 = vmatprep.mubr.bf16.mxu0 %v3179_v16  ;;  %2559 = vmatprep.mubr.bf16.mxu1 %v3180_v17 }
 0x14e   : > { %2528 = vmatmul.mubr.bf16.gmra.mrb[8].mxu0 %v3181_v18  ;;  %2560 = vmatmul.mubr.bf16.gmra.mrb[8].mxu1 %v3182_v19 }
 0x14f   : > { %2531 = vmatprep.mubr.bf16.mxu0 %v3183_v20  ;;  %2563 = vmatprep.mubr.bf16.mxu1 %v3184_v21 }
 0x156   : > { %2532 = vmatmul.mubr.bf16.gmra.mrb[12].mxu0 %v3185_v22  ;;  %2564 = vmatmul.mubr.bf16.gmra.mrb[12].mxu1 %v3186_v23 }
 0x157   : > { %2535 = vmatprep.mubr.bf16.mxu0 %v3187_v24  ;;  %2567 = vmatprep.mubr.bf16.mxu1 %v3188_v25 }
 0x15e   : > { %2536 = vmatmul.mubr.bf16.gmra.mrb[16].mxu0 %v3189_v26  ;;  %2568 = vmatmul.mubr.bf16.gmra.mrb[16].mxu1 %v3190_v27 }
 0x15f   : > { %2539 = vmatprep.mubr.bf16.mxu0 %v3191_v28  ;;  %2571 = vmatprep.mubr.bf16.mxu1 %v3192_v29 }
 0x166   : > { %2540 = vmatmul.mubr.bf16.gmra.mrb[20].mxu0 %v3193_v30  ;;  %2572 = vmatmul.mubr.bf16.gmra.mrb[20].mxu1 %v3194_v31 }
 0x167   : > { %2543 = vmatprep.mubr.bf16.mxu0 %v3195_v32  ;;  %2575 = vmatprep.mubr.bf16.mxu1 %v3196_v33 }
 0x16e   : > { %2544 = vmatmul.mubr.bf16.gmra.mrb[24].mxu0 %v3197_v34  ;;  %2576 = vmatmul.mubr.bf16.gmra.mrb[24].mxu1 %v3198_v35 }
 0x16f   : > { %2547 = vmatprep.mubr.bf16.mxu0 %v3199_v36  ;;  %2579 = vmatprep.mubr.bf16.mxu1 %v3200_v37 }
 0x176   : > { %2548 = vmatmul.mubr.bf16.gmra.mrb[28].mxu0 %v3201_v38  ;;  %2580 = vmatmul.mubr.bf16.gmra.mrb[28].mxu1 %v3202_v39 }
 0x211   : > { %v4118_v40 = vpop.f32.mrb[0].mxu0  ;;  %v4120_v41 = vpop.f32.mrb[0].mxu1 }
 0x212   : > { %v4122_v42 = vpop.f32.mrb[1].mxu0  ;;  %v4124_v43 = vpop.f32.mrb[1].mxu1 }
 0x213   : > { %5053 = vst [vmem:[#allocation46_spill] sm:$0xff] %v4122_v42  ;;  %5054 = vst [vmem:[#allocation47_spill] sm:$0xff] %v4124_v43  ;;  %v4126_v44 = vpop.f32.mrb[2].mxu0  ;;  %v4128_v45 = vpop.f32.mrb[2].mxu1 }
 0x214   : > { %v4130_v46 = vpop.f32.mrb[3].mxu0  ;;  %v4132_v47 = vpop.f32.mrb[3].mxu1 }
 0x215   : > { %5055 = vst [vmem:[#allocation48_spill] sm:$0xff] %v4130_v46  ;;  %5056 = vst [vmem:[#allocation49_spill] sm:$0xff] %v4132_v47 }
 0x219   : > { %v4134_v48 = vpop.f32.mrb[4].mxu0  ;;  %v4136_v49 = vpop.f32.mrb[4].mxu1 }
 0x21a   : > { %v4138_v50 = vpop.f32.mrb[5].mxu0  ;;  %v4140_v51 = vpop.f32.mrb[5].mxu1 }
 0x21b   : > { %v4142_v52 = vpop.f32.mrb[6].mxu0  ;;  %v4144_v53 = vpop.f32.mrb[6].mxu1 }
 0x21c   : > { %v4146_v54 = vpop.f32.mrb[7].mxu0  ;;  %v4148_v55 = vpop.f32.mrb[7].mxu1 }
 0x221   : > { %v4150_v56 = vpop.f32.mrb[8].mxu0  ;;  %v4152_v57 = vpop.f32.mrb[8].mxu1 }
 0x222   : > { %v4154_v58 = vpop.f32.mrb[9].mxu0  ;;  %v4156_v59 = vpop.f32.mrb[9].mxu1 }
 0x223   : > { %v4158_v60 = vpop.f32.mrb[10].mxu0  ;;  %v4160_v61 = vpop.f32.mrb[10].mxu1 }
 0x224   : > { %v4162_v62 = vpop.f32.mrb[11].mxu0  ;;  %v4164_v63 = vpop.f32.mrb[11].mxu1 }
 0x229   : > { %v4166_v0 = vpop.f32.mrb[12].mxu0  ;;  %v4168_v1 = vpop.f32.mrb[12].mxu1 }
 0x22a   : > { %5057 = vst [vmem:[#allocation50_spill] sm:$0xff] %v4166_v0  ;;  %5058 = vst [vmem:[#allocation51_spill] sm:$0xff] %v4168_v1  ;;  %v4170_v2 = vpop.f32.mrb[13].mxu0  ;;  %v4172_v3 = vpop.f32.mrb[13].mxu1 }
 0x22b   : > { %5059 = vst [vmem:[#allocation52_spill] sm:$0xff] %v4170_v2  ;;  %5060 = vst [vmem:[#allocation53_spill] sm:$0xff] %v4172_v3  ;;  %v4174_v4 = vpop.f32.mrb[14].mxu0  ;;  %v4176_v5 = vpop.f32.mrb[14].mxu1 }
 0x22c   : > { %5061 = vst [vmem:[#allocation54_spill] sm:$0xff] %v4174_v4  ;;  %5062 = vst [vmem:[#allocation55_spill] sm:$0xff] %v4176_v5  ;;  %v4178_v6 = vpop.f32.mrb[15].mxu0  ;;  %v4180_v7 = vpop.f32.mrb[15].mxu1  ;;  %v3585_v5 = vmov (!%p4114_p13), 0.0  }
 0x22d   : > { %5063 = vst [vmem:[#allocation56_spill] sm:$0xff] %v4178_v6  ;;  %5064 = vst [vmem:[#allocation57_spill] sm:$0xff] %v4180_v7 }
 0x22e   : > { %1080 = vst [vmem:[#allocation2] sm:$0x1] (!%p4114_p13), %v3585_v5  ;;  %1081 = vst [vmem:[#allocation3] sm:$0x1] (!%p4114_p13), %v3585_v5 }
 0x231   : > { %v4182_v8 = vpop.f32.mrb[16].mxu0  ;;  %v4184_v9 = vpop.f32.mrb[16].mxu1 }
 0x232   : > { %5065 = vst [vmem:[#allocation58_spill] sm:$0xff] %v4182_v8  ;;  %v4186_v10 = vpop.f32.mrb[17].mxu0  ;;  %v4188_v11 = vpop.f32.mrb[17].mxu1 }
 0x233   : > { %5066 = vst [vmem:[#allocation59_spill] sm:$0xff] %v4186_v10  ;;  %5067 = vst [vmem:[#allocation60_spill] sm:$0xff] %v4188_v11  ;;  %v4190_v12 = vpop.f32.mrb[18].mxu0  ;;  %v4192_v13 = vpop.f32.mrb[18].mxu1 }
 0x234   : > { %5068 = vst [vmem:[#allocation61_spill] sm:$0xff] %v4190_v12  ;;  %v4194_v14 = vpop.f32.mrb[19].mxu0  ;;  %v4196_v15 = vpop.f32.mrb[19].mxu1 }
 0x235   : > { %5069 = vst [vmem:[#allocation62_spill] sm:$0xff] %v4194_v14  ;;  %5070 = vst [vmem:[#allocation63_spill] sm:$0xff] %v4196_v15 }
 0x239   : > { %v4198_v16 = vpop.f32.mrb[20].mxu0  ;;  %v4200_v17 = vpop.f32.mrb[20].mxu1 }
 0x23a   : > { %v4202_v18 = vpop.f32.mrb[21].mxu0  ;;  %v4204_v19 = vpop.f32.mrb[21].mxu1 }
 0x23b   : > { %v4206_v20 = vpop.f32.mrb[22].mxu0  ;;  %v4208_v21 = vpop.f32.mrb[22].mxu1 }
 0x23c   : > { %5071 = vst [vmem:[#allocation64_spill] sm:$0xff] %v4208_v21  ;;  %v4210_v22 = vpop.f32.mrb[23].mxu0  ;;  %v4212_v23 = vpop.f32.mrb[23].mxu1 }
 0x23d   : > { %5072 = vst [vmem:[#allocation65_spill] sm:$0xff] %v4212_v23 }
 0x241   : > { %v4214_v24 = vpop.f32.mrb[24].mxu0  ;;  %v4216_v25 = vpop.f32.mrb[24].mxu1 }
 0x242   : > { %5073 = vst [vmem:[#allocation66_spill] sm:$0xff] %v4216_v25  ;;  %v4218_v26 = vpop.f32.mrb[25].mxu0  ;;  %v4220_v27 = vpop.f32.mrb[25].mxu1 }
 0x243   : > { %5074 = vst [vmem:[#allocation67_spill] sm:$0xff] %v4220_v27  ;;  %v4222_v28 = vpop.f32.mrb[26].mxu0  ;;  %v4224_v29 = vpop.f32.mrb[26].mxu1 }
 0x244   : > { %5075 = vst [vmem:[#allocation68_spill] sm:$0xff] %v4224_v29  ;;  %v4226_v30 = vpop.f32.mrb[27].mxu0  ;;  %v4228_v31 = vpop.f32.mrb[27].mxu1 }
 0x245   : > { %5076 = vst [vmem:[#allocation69_spill] sm:$0xff] %v4228_v31 }
 0x247   : > { %1079 = sbr.rel (%p4114_p13) target bundleno = 590 (0x24e), region = 72 }
 0x249   : > { %v4230_v32 = vpop.f32.mrb[28].mxu0  ;;  %v4232_v33 = vpop.f32.mrb[28].mxu1 }
 0x24a   : > { %5077 = vst [vmem:[#allocation70_spill] sm:$0xff] %v4230_v32  ;;  %5078 = vst [vmem:[#allocation71_spill] sm:$0xff] %v4232_v33  ;;  %v4234_v34 = vpop.f32.mrb[29].mxu0  ;;  %v4236_v35 = vpop.f32.mrb[29].mxu1 }
 0x24b   : > { %5079 = vst [vmem:[#allocation72_spill] sm:$0xff] %v4236_v35  ;;  %v4238_v36 = vpop.f32.mrb[30].mxu0  ;;  %v4240_v37 = vpop.f32.mrb[30].mxu1 }
 0x24c   : > { %5080 = vst [vmem:[#allocation73_spill] sm:$0xff] %v4238_v36  ;;  %5081 = vst [vmem:[#allocation74_spill] sm:$0xff] %v4240_v37  ;;  %v4242_v38 = vpop.f32.mrb[31].mxu0  ;;  %v4244_v39 = vpop.f32.mrb[31].mxu1 }
 0x24d   : > { %5082 = vst [vmem:[#allocation75_spill] sm:$0xff] %v4242_v38  ;;  %5083 = vst [vmem:[#allocation76_spill] sm:$0xff] %v4244_v39 }
 0x24e PF: > { %s5084_s16 = sld [smem:[#allocation29_spill]] }
 0x254   : > { %p2243_p5 = scmp.ne.s32.totalorder %s5084_s16, 0 }
 0x255   : > { %v2723_v1 = vpack.c.bf16 (!%p2243_p5), %v4194_v14, %v4186_v10  ;;  %v2755_v4 = vpack.c.bf16 (!%p2243_p5), %v4196_v15, %v4188_v11  ;;  %v2725_v0 = vpack.c.bf16 (!%p2243_p5), %v4130_v46, %v4122_v42  ;;  %v2757_v37 = vpack.c.bf16 (!%p2243_p5), %v4132_v47, %v4124_v43 }
 0x256   : > { %1084 = sbr.rel (%p2243_p5) target bundleno = 883 (0x373), region = 76  ;;  %v2727_v33 = vpack.c.bf16 (!%p2243_p5), %v4190_v12, %v4182_v8  ;;  %v2759_v5 = vpack.c.bf16 (!%p2243_p5), %v4192_v13, %v4184_v9  ;;  %v2729_v14 = vpack.c.bf16 (!%p2243_p5), %v4126_v44, %v4118_v40  ;;  %v2761_v15 = vpack.c.bf16 (!%p2243_p5), %v4128_v45, %v4120_v41 }
 0x257   : > { %2724 = vmatprep.subr.bf16.mxu0 (!%p2243_p5), %v2723_v1  ;;  %2756 = vmatprep.subr.bf16.mxu1 (!%p2243_p5), %v2755_v4  ;;  %v2731_v47 = vpack.c.bf16 (!%p2243_p5), %v4210_v22, %v4202_v18  ;;  %v2763_v12 = vpack.c.bf16 (!%p2243_p5), %v4212_v23, %v4204_v19  ;;  %v4951_v8 = vmov (!%p2243_p5), 1.0   ;;  %v2765_v1 = vpack.c.bf16 (!%p2243_p5), %v4148_v55, %v4140_v51 }
 0x258   : > { %2726 = vmatpush3.bf16.msra.mxu0 (!%p2243_p5), %v2725_v0  ;;  %2758 = vmatpush3.bf16.msra.mxu1 (!%p2243_p5), %v2757_v37  ;;  %v2733_v0 = vpack.c.bf16 (!%p2243_p5), %v4146_v54, %v4138_v50  ;;  %v2735_v4 = vpack.c.bf16 (!%p2243_p5), %v4206_v20, %v4198_v16  ;;  %v2741_v37 = vpack.c.bf16 (!%p2243_p5), %v4162_v62, %v4154_v58 }
 0x259   : > { %2728 = vmatprep.subr.bf16.mxu0 (!%p2243_p5), %v2727_v33  ;;  %2760 = vmatprep.subr.bf16.mxu1 (!%p2243_p5), %v2759_v5  ;;  %v2767_v33 = vpack.c.bf16 (!%p2243_p5), %v4208_v21, %v4200_v17  ;;  %v2773_v5 = vpack.c.bf16 (!%p2243_p5), %v4164_v63, %v4156_v59 }
 0x25a   : > { %1150 = vmatprep.mubr.f32.mxu0 (!%p2243_p5), %v4951_v8  ;;  %1220 = vmatprep.mubr.f32.mxu1 (!%p2243_p5), %v4951_v8  ;;  %v5086_v8 = vld [vmem:[#allocation71_spill] sm:$0xff] (!%p2243_p5) }
 0x25c   : > { %2730 = vmatpush3.bf16.msra.mxu0 (!%p2243_p5), %v2729_v14  ;;  %2762 = vmatpush3.bf16.msra.mxu1 (!%p2243_p5), %v2761_v15  ;;  %v2737_v14 = vpack.c.bf16 (!%p2243_p5), %v4142_v52, %v4134_v48  ;;  %v2769_v15 = vpack.c.bf16 (!%p2243_p5), %v4144_v53, %v4136_v49 }
 0x25d   : > { %2732 = vmatprep.subr.bf16.mxu0 %v2731_v47  ;;  %2764 = vmatprep.subr.bf16.mxu1 %v2763_v12  ;;  %v2739_v47 = vpack.c.bf16 %v4226_v30, %v4218_v26  ;;  %v2771_v12 = vpack.c.bf16 %v4228_v31, %v4220_v27 }
 0x260   : > { %2734 = vmatpush3.bf16.msra.mxu0 %v2733_v0  ;;  %2766 = vmatpush3.bf16.msra.mxu1 %v2765_v1  ;;  %v2743_v0 = vpack.c.bf16 %v4222_v28, %v4214_v24  ;;  %v2775_v1 = vpack.c.bf16 %v4224_v29, %v4216_v25 }
 0x261   : > { %2736 = vmatprep.subr.bf16.mxu0 %v2735_v4  ;;  %2768 = vmatprep.subr.bf16.mxu1 %v2767_v33  ;;  %v2745_v4 = vpack.c.bf16 %v4158_v60, %v4150_v56  ;;  %v2777_v33 = vpack.c.bf16 %v4160_v61, %v4152_v57 }
 0x264   : > { %2738 = vmatpush3.bf16.msra.mxu0 %v2737_v14  ;;  %2770 = vmatpush3.bf16.msra.mxu1 %v2769_v15  ;;  %v2747_v14 = vpack.c.bf16 %v4242_v38, %v4234_v34  ;;  %v2779_v15 = vpack.c.bf16 %v4244_v39, %v4236_v35  ;;  %v5087_v39 = vld [vmem:[#allocation74_spill] sm:$0xff]  ;;  %v5095_v38 = vld [vmem:[#allocation61_spill] sm:$0xff] }
 0x265   : > { %2740 = vmatprep.subr.bf16.mxu0 %v2739_v47  ;;  %2772 = vmatprep.subr.bf16.mxu1 %v2771_v12  ;;  %v2749_v47 = vpack.c.bf16 %v4178_v6, %v4170_v2  ;;  %v2781_v12 = vpack.c.bf16 %v4180_v7, %v4172_v3  ;;  %v2783_v35 = vpack.c.bf16 %v5087_v39, %v5086_v8  ;;  %v5088_v7 = vld [vmem:[#allocation63_spill] sm:$0xff]  ;;  %v5091_v39 = vld [vmem:[#allocation54_spill] sm:$0xff] }
 0x266   : > { %v1277_v6 = vmul.f32 %v4188_v11, %v4188_v11  ;;  %v5093_v11 = vld [vmem:[#allocation55_spill] sm:$0xff]  ;;  %v5094_v2 = vld [vmem:[#allocation58_spill] sm:$0xff] }
 0x268   : > { %2742 = vmatpush3.bf16.msra.mxu0 %v2741_v37  ;;  %2774 = vmatpush3.bf16.msra.mxu1 %v2773_v5  ;;  %v2751_v37 = vpack.c.bf16 %v4238_v36, %v4230_v32  ;;  %v1245_v5 = vmul.f32 %v4186_v10, %v4186_v10  ;;  %v1230_v10 = vmul.f32 %v4130_v46, %v4130_v46  ;;  %v5090_v36 = vld [vmem:[#allocation50_spill] sm:$0xff]  ;;  %v5092_v32 = vld [vmem:[#allocation51_spill] sm:$0xff] }
 0x269   : > { %2744 = vmatprep.subr.bf16.mxu0 %v2743_v0  ;;  %2776 = vmatprep.subr.bf16.mxu1 %v2775_v1  ;;  %v5085_v0 = vld [vmem:[#allocation62_spill] sm:$0xff]  ;;  %v2753_v8 = vpack.c.bf16 %v5091_v39, %v5090_v36  ;;  %v2785_v3 = vpack.c.bf16 %v5093_v11, %v5092_v32  ;;  %v1248_v46 = vmul.f32 %v5095_v38, %v5095_v38 }
 0x26a   : > { %v1246_v1 = vmul.f32 %v5085_v0, %v5085_v0  ;;  %v1261_v0 = vmul.f32 %v4124_v43, %v4124_v43  ;;  %v1280_v39 = vmul.f32 %v4192_v13, %v4192_v13  ;;  %v1263_v38 = vmul.f32 %v4120_v41, %v4120_v41 }
 0x26c   : > { %2746 = vmatpush3.bf16.msra.mxu0 %v2745_v4  ;;  %2778 = vmatpush3.bf16.msra.mxu1 %v2777_v33  ;;  %v1278_v4 = vmul.f32 %v5088_v7, %v5088_v7  ;;  %v1229_v33 = vmul.f32 %v4122_v42, %v4122_v42  ;;  %v2787_v7 = vpack.c.bf16 %v1246_v1, %v1245_v5 }
 0x26d   : > { %2748 = vmatprep.subr.bf16.mxu0 %v2747_v14  ;;  %2780 = vmatprep.subr.bf16.mxu1 %v2779_v15  ;;  %v5089_v14 = vld [vmem:[#allocation49_spill] sm:$0xff]  ;;  %v1247_v42 = vmul.f32 %v5094_v2, %v5094_v2  ;;  %v1232_v2 = vmul.f32 %v4126_v44, %v4126_v44  ;;  %v1281_v5 = vmul.f32 %v4204_v19, %v4204_v19 }
 0x26e   : > { %v1262_v15 = vmul.f32 %v5089_v14, %v5089_v14  ;;  %v2819_v43 = vpack.c.bf16 %v1278_v4, %v1277_v6  ;;  %v1279_v14 = vmul.f32 %v4184_v9, %v4184_v9  ;;  %v2789_v36 = vpack.c.bf16 %v1230_v10, %v1229_v33 }
 0x26f   : > { %v1264_v6 = vmul.f32 %v4128_v45, %v4128_v45  ;;  %v1250_v10 = vmul.f32 %v4210_v22, %v4210_v22  ;;  %v1282_v1 = vmul.f32 %v4212_v23, %v4212_v23  ;;  %v1284_v23 = vmul.f32 %v4208_v21, %v4208_v21  ;;  %v5103_v21 = vld [vmem:[#allocation57_spill] sm:$0xff] }
 0x270   : > { %2750 = vmatpush3.bf16.msra.mxu0 %v2749_v47  ;;  %2782 = vmatpush3.bf16.msra.mxu1 %v2781_v12  ;;  %v2821_v11 = vpack.c.bf16 %v1262_v15, %v1261_v0  ;;  %v1231_v47 = vmul.f32 %v4118_v40, %v4118_v40  ;;  %v1249_v12 = vmul.f32 %v4202_v18, %v4202_v18 }
 0x271   : > { %2752 = vmatprep.subr.bf16.mxu0 %v2751_v37  ;;  %2784 = vmatprep.subr.bf16.mxu1 %v2783_v35  ;;  %v2791_v35 = vpack.c.bf16 %v1248_v46, %v1247_v42  ;;  %v2823_v37 = vpack.c.bf16 %v1280_v39, %v1279_v14  ;;  %v1234_v42 = vmul.f32 %v4146_v54, %v4146_v54 }
 0x272   : > { %v1265_v46 = vmul.f32 %v4140_v51, %v4140_v51  ;;  %v2793_v39 = vpack.c.bf16 %v1232_v2, %v1231_v47  ;;  %v2825_v4 = vpack.c.bf16 %v1264_v6, %v1263_v38  ;;  %v2795_v33 = vpack.c.bf16 %v1250_v10, %v1249_v12 }
 0x273   : > { %v1251_v0 = vmul.f32 %v4198_v16, %v4198_v16  ;;  %v1252_v15 = vmul.f32 %v4206_v20, %v4206_v20  ;;  %v1283_v14 = vmul.f32 %v4200_v17, %v4200_v17  ;;  %v1267_v38 = vmul.f32 %v4136_v49, %v4136_v49 }
 0x274   : > { %2754 = vmatpush3.bf16.msra.mxu0 %v2753_v8  ;;  %2786 = vmatpush3.bf16.msra.mxu1 %v2785_v3  ;;  %v1233_v8 = vmul.f32 %v4138_v50, %v4138_v50  ;;  %v1266_v3 = vmul.f32 %v4148_v55, %v4148_v55  ;;  %v1268_v6 = vmul.f32 %v4144_v53, %v4144_v53 }
 0x275   : > { %2788 = vmatprep.subr.bf16.mxu0 %v2787_v7  ;;  %2820 = vmatprep.subr.bf16.mxu1 %v2819_v43  ;;  %v5096_v43 = vmov 1.0   ;;  %v2827_v7 = vpack.c.bf16 %v1282_v1, %v1281_v5  ;;  %v1254_v12 = vmul.f32 %v4226_v30, %v4226_v30  ;;  %v1285_v10 = vmul.f32 %v4220_v27, %v4220_v27  ;;  %v5102_v27 = vld [vmem:[#allocation53_spill] sm:$0xff] }
 0x276   : > { %v2797_v47 = vpack.c.bf16 %v1234_v42, %v1233_v8  ;;  %v2829_v2 = vpack.c.bf16 %v1266_v3, %v1265_v46  ;;  %v2799_v5 = vpack.c.bf16 %v1252_v15, %v1251_v0  ;;  %v2831_v1 = vpack.c.bf16 %v1284_v23, %v1283_v14 }
 0x277   : > { %1151 = vmatmul.mubr.f32.vlgmr.msra.gmra.mrb[0].mxu0 %v5096_v43  ;;  %1221 = vmatmul.mubr.f32.vlgmr.msra.gmra.mrb[0].mxu1 %v5096_v43  ;;  %v1237_v8 = vmul.f32 %v4154_v58, %v4154_v58  ;;  %v1238_v42 = vmul.f32 %v4162_v62, %v4162_v62  ;;  %v2833_v3 = vpack.c.bf16 %v1268_v6, %v1267_v38 }
 0x278   : > { %2790 = vmatpush3.bf16.msra.mxu0 %v2789_v36  ;;  %2822 = vmatpush3.bf16.msra.mxu1 %v2821_v11  ;;  %v1235_v11 = vmul.f32 %v4134_v48, %v4134_v48  ;;  %v1236_v36 = vmul.f32 %v4142_v52, %v4142_v52  ;;  %v1255_v23 = vmul.f32 %v4214_v24, %v4214_v24 }
 0x279   : > { %2792 = vmatprep.subr.bf16.mxu0 %v2791_v35  ;;  %2824 = vmatprep.subr.bf16.mxu1 %v2823_v37  ;;  %v1253_v35 = vmul.f32 %v4218_v26, %v4218_v26  ;;  %v1286_v37 = vmul.f32 %v4228_v31, %v4228_v31  ;;  %v1256_v0 = vmul.f32 %v4222_v28, %v4222_v28 }
 0x27a   : > { %1357 = vmatprep.mubr.f32.mxu0 %v5096_v43  ;;  %1427 = vmatprep.mubr.f32.mxu1 %v5096_v43  ;;  %v2801_v46 = vpack.c.bf16 %v1236_v36, %v1235_v11  ;;  %v1287_v15 = vmul.f32 %v4216_v25, %v4216_v25  ;;  %v1288_v14 = vmul.f32 %v4224_v29, %v4224_v29  ;;  %v5100_v29 = vld [vmem:[#allocation52_spill] sm:$0xff] }
 0x27b   : > { %v2805_v11 = vpack.c.bf16 %v1238_v42, %v1237_v8  ;;  %v1271_v38 = vmul.f32 %v4152_v57, %v4152_v57  ;;  %v1272_v6 = vmul.f32 %v4160_v61, %v4160_v61  ;;  %v2807_v42 = vpack.c.bf16 %v1256_v0, %v1255_v23  ;;  %v5104_v23 = vld [vmem:[#allocation70_spill] sm:$0xff] }
 0x27c   : > { %2794 = vmatpush3.bf16.msra.mxu0 %v2793_v39  ;;  %2826 = vmatpush3.bf16.msra.mxu1 %v2825_v4  ;;  %v1269_v39 = vmul.f32 %v4156_v59, %v4156_v59  ;;  %v1270_v4 = vmul.f32 %v4164_v63, %v4164_v63  ;;  %v1241_v25 = vmul.f32 %v5100_v29, %v5100_v29  ;;  %v5105_v29 = vld [vmem:[#allocation73_spill] sm:$0xff] }
 0x27d   : > { %2796 = vmatprep.subr.bf16.mxu0 %v2795_v33  ;;  %2828 = vmatprep.subr.bf16.mxu1 %v2827_v7  ;;  %v2803_v33 = vpack.c.bf16 %v1254_v12, %v1253_v35  ;;  %v2835_v7 = vpack.c.bf16 %v1286_v37, %v1285_v10  ;;  %v1257_v35 = vmul.f32 %v4234_v34, %v4234_v34  ;;  %v5097_v12 = vld [vmem:[#allocation75_spill] sm:$0xff]  ;;  %v5098_v37 = vld [vmem:[#allocation72_spill] sm:$0xff] }
 0x27e   : > { %v2837_v36 = vpack.c.bf16 %v1270_v4, %v1269_v39  ;;  %v1258_v10 = vmul.f32 %v5097_v12, %v5097_v12  ;;  %v2839_v39 = vpack.c.bf16 %v1288_v14, %v1287_v15  ;;  %v2841_v31 = vpack.c.bf16 %v1272_v6, %v1271_v38  ;;  %v5106_v14 = vld [vmem:[#allocation71_spill] sm:$0xff]  ;;  %v5109_v6 = vld [vmem:[#allocation54_spill] sm:$0xff] }
 0x27f   : > { %v1273_v12 = vmul.f32 %v5102_v27, %v5102_v27  ;;  %v1259_v0 = vmul.f32 %v5104_v23, %v5104_v23  ;;  %v1260_v15 = vmul.f32 %v5105_v29, %v5105_v29 }
 0x280   : > { %2798 = vmatpush3.bf16.msra.mxu0 %v2797_v47  ;;  %2830 = vmatpush3.bf16.msra.mxu1 %v2829_v2  ;;  %v1239_v47 = vmul.f32 %v4150_v56, %v4150_v56  ;;  %v1240_v2 = vmul.f32 %v4158_v60, %v4158_v60 }
 0x281   : > { %2800 = vmatprep.subr.bf16.mxu0 %v2799_v5  ;;  %2832 = vmatprep.subr.bf16.mxu1 %v2831_v1  ;;  %v1289_v5 = vmul.f32 %v5098_v37, %v5098_v37  ;;  %v5099_v1 = vld [vmem:[#allocation76_spill] sm:$0xff]  ;;  %v1274_v37 = vmul.f32 %v5103_v21, %v5103_v21 }
 0x282   : > { %v1290_v8 = vmul.f32 %v5099_v1, %v5099_v1  ;;  %v2809_v4 = vpack.c.bf16 %v1240_v2, %v1239_v47  ;;  %v1291_v47 = vmul.f32 %v5106_v14, %v5106_v14  ;;  %v5107_v2 = vld [vmem:[#allocation74_spill] sm:$0xff] }
 0x283   : > { %v1292_v27 = vmul.f32 %v5107_v2, %v5107_v2  ;;  %v2845_v21 = vpack.c.bf16 %v1274_v37, %v1273_v12  ;;  %v1085_v37 = vld [vmem:[#allocation2] sm:$0x1]  ;;  %v1228_v2 = vld [vmem:[#allocation3] sm:$0x1] }
 0x284   : > { %2802 = vmatpush3.bf16.msra.mxu0 %v2801_v46  ;;  %2834 = vmatpush3.bf16.msra.mxu1 %v2833_v3  ;;  %v5101_v46 = vld [vmem:[#allocation56_spill] sm:$0xff] }
 0x285   : > { %2804 = vmatprep.subr.bf16.mxu0 %v2803_v33  ;;  %2836 = vmatprep.subr.bf16.mxu1 %v2835_v7  ;;  %v1242_v3 = vmul.f32 %v5101_v46, %v5101_v46  ;;  %v2811_v33 = vpack.c.bf16 %v1258_v10, %v1257_v35  ;;  %v2843_v7 = vpack.c.bf16 %v1290_v8, %v1289_v5  ;;  %v5110_v5 = vld [vmem:[#allocation55_spill] sm:$0xff] }
 0x286   : > { %v1244_v35 = vmul.f32 %v5109_v6, %v5109_v6  ;;  %v1275_v10 = vmul.f32 %v5092_v32, %v5092_v32  ;;  %v1276_v1 = vmul.f32 %v5110_v5, %v5110_v5  ;;  %v2815_v8 = vpack.c.bf16 %v1260_v15, %v1259_v0 }
 0x287   : > { %v2813_v38 = vpack.c.bf16 %v1242_v3, %v1241_v25 }
 0x288   : > { %2806 = vmatpush3.bf16.msra.mxu0 %v2805_v11  ;;  %2838 = vmatpush3.bf16.msra.mxu1 %v2837_v36  ;;  %v5108_v11 = vld [vmem:[#allocation50_spill] sm:$0xff] }
 0x289   : > { %2808 = vmatprep.subr.bf16.mxu0 %v2807_v42  ;;  %2840 = vmatprep.subr.bf16.mxu1 %v2839_v39  ;;  %v1243_v36 = vmul.f32 %v5108_v11, %v5108_v11  ;;  %v2847_v42 = vpack.c.bf16 %v1292_v27, %v1291_v47  ;;  %v2849_v39 = vpack.c.bf16 %v1276_v1, %v1275_v10 }
 0x28b   : > { %v2817_v25 = vpack.c.bf16 %v1244_v35, %v1243_v36 }
 0x28c   : > { %2810 = vmatpush3.bf16.msra.mxu0 %v2809_v4  ;;  %2842 = vmatpush3.bf16.msra.mxu1 %v2841_v31 }
 0x28d   : > { %2812 = vmatprep.subr.bf16.mxu0 %v2811_v33  ;;  %2844 = vmatprep.subr.bf16.mxu1 %v2843_v7 }
 0x290   : > { %2814 = vmatpush3.bf16.msra.mxu0 %v2813_v38  ;;  %2846 = vmatpush3.bf16.msra.mxu1 %v2845_v21 }
 0x291   : > { %2816 = vmatprep.subr.bf16.mxu0 %v2815_v8  ;;  %2848 = vmatprep.subr.bf16.mxu1 %v2847_v42 }
 0x294   : > { %2818 = vmatpush3.bf16.msra.mxu0 %v2817_v25  ;;  %2850 = vmatpush3.bf16.msra.mxu1 %v2849_v39 }
 0x297   : > { %1358 = vmatmul.mubr.f32.vlgmr.msra.gmra.mrb[2].mxu0 %v5096_v43  ;;  %1428 = vmatmul.mubr.f32.vlgmr.msra.gmra.mrb[2].mxu1 %v5096_v43 }
 0x34a   : > { %v2327_v31 = vpop.f32.mrb[0].mxu0  ;;  %v2362_v32 = vpop.f32.mrb[0].mxu1 }
 0x34b   : > { %v2328_v4 = vpop.f32.mrb[1].mxu0  ;;  %v2363_v46 = vpop.f32.mrb[1].mxu1 }
 0x34c   : > { %v2329_v3 = vadd.f32 %v2328_v4, %v2327_v31  ;;  %v2364_v12 = vadd.f32 %v2363_v46, %v2362_v32 }
 0x34e   : > { %v1223_v33 = vadd.f32 %v2364_v12, %v2329_v3 }
 0x350   : > { %v1226_v7 = vadd.f32 %v1223_v33, %v1085_v37 }
 0x352   : > { %1227 = vst [vmem:[#allocation2] sm:$0x1] %v1226_v7 }
 0x36a   : > { %v2397_v23 = vpop.f32.mrb[2].mxu0  ;;  %v2432_v0 = vpop.f32.mrb[2].mxu1 }
 0x36b   : > { %v2398_v29 = vpop.f32.mrb[3].mxu0  ;;  %v2433_v15 = vpop.f32.mrb[3].mxu1 }
 0x36c   : > { %v2399_v14 = vadd.f32 %v2398_v29, %v2397_v23  ;;  %v2434_v47 = vadd.f32 %v2433_v15, %v2432_v0 }
 0x36e   : > { %v1430_v27 = vadd.f32 %v2434_v47, %v2399_v14 }
 0x370   : > { %v1433_v38 = vadd.f32 %v1430_v27, %v1228_v2 }
 0x372   : > { %1434 = vst [vmem:[#allocation3] sm:$0x1] %v1433_v38 }
 0x373 PF: > { %s5111_s2 = sld [smem:[#allocation29_spill]] }
 0x379   : > { %p1435_p3 = scmp.eq.s32.totalorder %s5111_s2, 1 }
 0x37b   : > { %p1436_p0 = pnand %p1435_p3, %p1075_p1 }
 0x37c   : > { %v1440_v43 = vld [vmem:[#allocation15] sm:$0xff] (!%p1436_p0)  ;;  %v1441_v21 = vld [vmem:[#allocation15 + $0x8] sm:$0xff] (!%p1436_p0)  ;;  %v1442_v11 = vld [vmem:[#allocation15 + $0x10] sm:$0xff] (!%p1436_p0)  ;;  %v3587_v36 = vmov (!%p1436_p0), 0.0|0.0   ;;  %vm3588_vm0 = vmmov (!%p1436_p0), 0   ;;  %v3589_v10 = vmov (!%p1436_p0), 0.0  }
 0x37d   : > { %1439 = sbr.rel (%p1436_p0) target bundleno = 1378 (0x562), region = 80  ;;  %2851 = vmatprep.subr.bf16.mxu0 (!%p1436_p0), %v3587_v36  ;;  %v4456_v6 = vpack.c.bf16 (!%p1436_p0), %v1441_v21, %v1440_v43  ;;  %2875 = vmatprep.subr.bf16.mxu1 (!%p1436_p0), %v3587_v36  ;;  %v1443_v35 = vld [vmem:[#allocation15 + $0x18] sm:$0xff] (!%p1436_p0)  ;;  %v1444_v1 = vld [vmem:[#allocation15 + $0x20] sm:$0xff] (!%p1436_p0)  ;;  %v1445_v8 = vld [vmem:[#allocation15 + $0x28] sm:$0xff] (!%p1436_p0) }
 0x37e   : > { %2615 = vmatprep.mubr.msk.f32.mxu0 (!%p1436_p0), %vm3588_vm0, %v3589_v10  ;;  %2650 = vmatprep.mubr.msk.f32.mxu1 (!%p1436_p0), %vm3588_vm0, %v3589_v10  ;;  %v4465_v5 = vpack.c.bf16 (!%p1436_p0), %v1443_v35, %v1442_v11  ;;  %v4471_v42 = vpack.c.bf16 (!%p1436_p0), %v1445_v8, %v1444_v1  ;;  %v1446_v25 = vld [vmem:[#allocation15 + $0x30] sm:$0xff] (!%p1436_p0)  ;;  %v1447_v39 = vld [vmem:[#allocation15 + $0x38] sm:$0xff] (!%p1436_p0)  ;;  %v1448_v32 = vld [vmem:[#allocation15 + $0x40] sm:$0xff] (!%p1436_p0) }
 0x37f   : > { %2853 = vmatpush3.bf16.msra.mxu0 (!%p1436_p0), %v4456_v6  ;;  %2877 = vmatpush3.bf16.msra.mxu1 (!%p1436_p0), %v4456_v6  ;;  %v2861_v31 = vpack.c.bf16 (!%p1436_p0), %v1447_v39, %v1446_v25  ;;  %v1449_v4 = vld [vmem:[#allocation15 + $0x48] sm:$0xff] (!%p1436_p0)  ;;  %v4481_v3 = vld [vmem:[%s395_s6] sm:$0x1] (!%p1436_p0)  ;;  %v1451_v37 = vld [vmem:[#allocation15 + $0x58] sm:$0xff] (!%p1436_p0) }
 0x380   : > { %2854 = vmatprep.subr.bf16.mxu0 (!%p1436_p0), %v3587_v36  ;;  %2878 = vmatprep.subr.bf16.mxu1 (!%p1436_p0), %v3587_v36  ;;  %v2864_v46 = vpack.c.bf16 (!%p1436_p0), %v1449_v4, %v1448_v32  ;;  %v1450_v12 = vld [vmem:[#allocation15 + $0x50] sm:$0xff] (!%p1436_p0)  ;;  %v1461_v33 = vmul.f32 (!%p1436_p0), 2.0, %v4481_v3  ;;  %v1452_v0 = vld [vmem:[#allocation15 + $0x60] sm:$0xff] (!%p1436_p0)  ;;  %v1453_v29 = vld [vmem:[#allocation15 + $0x68] sm:$0xff] (!%p1436_p0)  ;;  %v1458_v15 = vmul.f32 (!%p1436_p0), 1024.0, %v4481_v3 }
 0x381   : > { %v2867_v7 = vpack.c.bf16 (!%p1436_p0), %v1451_v37, %v1450_v12  ;;  %v1457_v23 = vld [vmem:[#allocation2] sm:$0x1] (!%p1436_p0)  ;;  %v2870_v47 = vpack.c.bf16 (!%p1436_p0), %v1453_v29, %v1452_v0  ;;  %v1460_v2 = vld [vmem:[#allocation3] sm:$0x1] (!%p1436_p0)  ;;  %v1455_v38 = vld [vmem:[#allocation15 + $0x78] sm:$0xff] (!%p1436_p0) }
 0x382   : > { %v1462_v14 = vmul.f32 (!%p1436_p0), %v1461_v33, %v1457_v23  ;;  %v1454_v27 = vld [vmem:[#allocation15 + $0x70] sm:$0xff] (!%p1436_p0)  ;;  %v1464_v21 = vmul.f32 (!%p1436_p0), %v1458_v15, %v4481_v3  ;;  %v1459_v35 = vadd.f32 (!%p1436_p0), %v1458_v15, %v1457_v23 }
 0x383   : > { %2856 = vmatpush3.bf16.msra.mxu0 (!%p1436_p0), %v4465_v5  ;;  %2880 = vmatpush3.bf16.msra.mxu1 (!%p1436_p0), %v4465_v5  ;;  %v2873_v11 = vpack.c.bf16 (!%p1436_p0), %v1455_v38, %v1454_v27  ;;  %v1753_v37 = vld [vmem:[%s403_s4] sm:$0x1] (!%p1436_p0) }
 0x384   : > { %2857 = vmatprep.subr.bf16.mxu0 %v3587_v36  ;;  %2881 = vmatprep.subr.bf16.mxu1 %v3587_v36  ;;  %v1463_v43 = vadd.f32 %v1462_v14, %v1460_v2  ;;  %v1756_v29 = vld [vmem:[%s411_s17] sm:$0x1] }
 0x386   : > { %v1465_v1 = vadd.f32 %v1464_v21, %v1463_v43 }
 0x387   : > { %2859 = vmatpush3.bf16.msra.mxu0 %v4471_v42  ;;  %2883 = vmatpush3.bf16.msra.mxu1 %v4471_v42 }
 0x388   : > { %2860 = vmatprep.subr.bf16.mxu0 %v3587_v36  ;;  %2884 = vmatprep.subr.bf16.mxu1 %v3587_v36 }
 0x38b   : > { %2862 = vmatpush3.bf16.msra.mxu0 %v2861_v31  ;;  %2886 = vmatpush3.bf16.msra.mxu1 %v2861_v31 }
 0x38c   : > { %2863 = vmatprep.subr.bf16.mxu0 %v3587_v36  ;;  %2887 = vmatprep.subr.bf16.mxu1 %v3587_v36 }
 0x38f   : > { %2865 = vmatpush3.bf16.msra.mxu0 %v2864_v46  ;;  %2889 = vmatpush3.bf16.msra.mxu1 %v2864_v46 }
 0x390   : > { %2866 = vmatprep.subr.bf16.mxu0 %v3587_v36  ;;  %2890 = vmatprep.subr.bf16.mxu1 %v3587_v36 }
 0x393   : > { %2868 = vmatpush3.bf16.msra.mxu0 %v2867_v7  ;;  %2892 = vmatpush3.bf16.msra.mxu1 %v2867_v7 }
 0x394   : > { %2869 = vmatprep.subr.bf16.mxu0 %v3587_v36  ;;  %2893 = vmatprep.subr.bf16.mxu1 %v3587_v36 }
 0x397   : > { %2871 = vmatpush3.bf16.msra.mxu0 %v2870_v47  ;;  %2895 = vmatpush3.bf16.msra.mxu1 %v2870_v47 }
 0x398   : > { %2872 = vmatprep.subr.bf16.mxu0 %v3587_v36  ;;  %2896 = vmatprep.subr.bf16.mxu1 %v3587_v36 }
 0x39b   : > { %2874 = vmatpush3.bf16.msra.mxu0 %v2873_v11  ;;  %2898 = vmatpush3.bf16.msra.mxu1 %v2873_v11 }
 0x39c   : > { %2899 = vmatprep.subr.bf16.mxu0 %v3587_v36  ;;  %2923 = vmatprep.subr.bf16.mxu1 %v3587_v36 }
 0x39e   : > { %2616 = vmatmul.mubr.f32.vlgmr.msra.gmra.mrb[0].mxu0 %v1459_v35  ;;  %2651 = vmatmul.mubr.f32.vlgmr.msra.gmra.mrb[0].mxu1 %v1465_v1 }
 0x39f   : > { %2685 = vmatprep.mubr.msk.f32.mxu0 %vm3588_vm0, %v3589_v10  ;;  %2720 = vmatprep.mubr.msk.f32.mxu1 %vm3588_vm0, %v3589_v10 }
 0x3a4   : > { %2901 = vmatpush3.bf16.xpose.msra.mxu0 %v4456_v6  ;;  %2925 = vmatpush3.bf16.xpose.msra.mxu1 %v4456_v6 }
 0x3a5   : > { %2902 = vmatprep.subr.bf16.mxu0 %v3587_v36  ;;  %2926 = vmatprep.subr.bf16.mxu1 %v3587_v36 }
 0x3ac   : > { %2904 = vmatpush3.bf16.xpose.msra.mxu0 %v4465_v5  ;;  %2928 = vmatpush3.bf16.xpose.msra.mxu1 %v4465_v5 }
 0x3ad   : > { %2905 = vmatprep.subr.bf16.mxu0 %v3587_v36  ;;  %2929 = vmatprep.subr.bf16.mxu1 %v3587_v36 }
 0x3b4   : > { %2907 = vmatpush3.bf16.xpose.msra.mxu0 %v4471_v42  ;;  %2931 = vmatpush3.bf16.xpose.msra.mxu1 %v4471_v42 }
 0x3b5   : > { %2908 = vmatprep.subr.bf16.mxu0 %v3587_v36  ;;  %2932 = vmatprep.subr.bf16.mxu1 %v3587_v36 }
 0x3bc   : > { %2910 = vmatpush3.bf16.xpose.msra.mxu0 %v2861_v31  ;;  %2934 = vmatpush3.bf16.xpose.msra.mxu1 %v2861_v31 }
 0x3bd   : > { %2911 = vmatprep.subr.bf16.mxu0 %v3587_v36  ;;  %2935 = vmatprep.subr.bf16.mxu1 %v3587_v36 }
 0x3c4   : > { %2913 = vmatpush3.bf16.xpose.msra.mxu0 %v2864_v46  ;;  %2937 = vmatpush3.bf16.xpose.msra.mxu1 %v2864_v46 }
 0x3c5   : > { %2914 = vmatprep.subr.bf16.mxu0 %v3587_v36  ;;  %2938 = vmatprep.subr.bf16.mxu1 %v3587_v36 }
 0x3cc   : > { %2916 = vmatpush3.bf16.xpose.msra.mxu0 %v2867_v7  ;;  %2940 = vmatpush3.bf16.xpose.msra.mxu1 %v2867_v7 }
 0x3cd   : > { %2917 = vmatprep.subr.bf16.mxu0 %v3587_v36  ;;  %2941 = vmatprep.subr.bf16.mxu1 %v3587_v36 }
 0x3d4   : > { %2919 = vmatpush3.bf16.xpose.msra.mxu0 %v2870_v47  ;;  %2943 = vmatpush3.bf16.xpose.msra.mxu1 %v2870_v47 }
 0x3d5   : > { %2920 = vmatprep.subr.bf16.mxu0 %v3587_v36  ;;  %2944 = vmatprep.subr.bf16.mxu1 %v3587_v36 }
 0x3dc   : > { %2922 = vmatpush3.bf16.xpose.msra.mxu0 %v2873_v11  ;;  %2946 = vmatpush3.bf16.xpose.msra.mxu1 %v2873_v11 }
 0x471   : > { %v1532_v6 = vpop.f32.mrb[0].mxu0  ;;  %v1602_v10 = vpop.f32.mrb[0].mxu1 }
 0x472   : > { %v1606_v5 = vmul.f32 0.00048828125, %v1532_v6  ;;  %v2617_v8 = vpop.f32.mrb[1].mxu0  ;;  %v1607_v42 = vmul.f32 0.00048828125, %v1602_v10  ;;  %v2652_v25 = vpop.f32.mrb[1].mxu1 }
 0x474   : > { %v1608_v39 = vmul.f32 %v1606_v5, %v1606_v5  ;;  %2686 = vmatmul.mubr.f32.vlgmr.msra.gmra.mrb[2].mxu0 %v1606_v5 }
 0x476   : > { %v1609_v31 = vsub.f32 %v1607_v42, %v1608_v39 }
 0x478   : > { %v1610_v32 = vmax.f32 %v1609_v31, 0.0 }
 0x47a   : > { %v1611_v4 = vadd.f32 1e-05, %v1610_v32 }
 0x47c   : > { %3203 = vrsqrt.f32 %v1611_v4 }
 0x486   : > { %v3204_v46 = vpop.eup %3203 }
 0x487   : > { %2721 = vmatmul.mubr.f32.vlgmr.msra.gmra.mrb[2].mxu1 %v3204_v46 }
 0x547   : > { %v1679_v12 = vpop.f32.mrb[2].mxu0 }
 0x548   : > { %v2687_v36 = vpop.f32.mrb[3].mxu0  ;;  %v1757_v7 = vsub.f32 %v4481_v3, %v1679_v12 }
 0x55a   : > { %v1749_v33 = vpop.f32.mrb[2].mxu1 }
 0x55b   : > { %v1754_v23 = vmul.f32 %v1753_v37, %v1749_v33  ;;  %v2722_v0 = vpop.f32.mrb[3].mxu1 }
 0x55d   : > { %1755 = vst [vmem:[#allocation4] sm:$0x1] %v1754_v23  ;;  %v1758_v15 = vmul.f32 %v1757_v7, %v1754_v23 }
 0x55f   : > { %v1759_v14 = vadd.f32 %v1758_v15, %v1756_v29 }
 0x561   : > { %1760 = vst [vmem:[#allocation5] sm:$0x1] %v1759_v14 }
 0x562 PF: > { %s5113_s24 = sld [smem:[#allocation29_spill]] }
 0x568   : > { %p2244_p7 = scmp.ne.s32.totalorder %s5113_s24, 1 }
 0x569   : > { %v4526_v47 = vld [vmem:[#allocation4] ss:$0 sm:$0xff] (!%p2244_p7)  ;;  %v4528_v2 = vld [vmem:[#allocation5] ss:$0 sm:$0xff] (!%p2244_p7)  ;;  %v5114_v27 = vld [vmem:[#allocation46_spill] sm:$0xff] (!%p2244_p7) }
 0x56a   : > { %1763 = sbr.rel (%p2244_p7) target bundleno = 1428 (0x594), region = 84  ;;  %v1771_v38 = vmul.f32 (!%p2244_p7), %v4526_v47, %v5114_v27  ;;  %v5115_v3 = vld [vmem:[#allocation48_spill] sm:$0xff] (!%p2244_p7)  ;;  %v1773_v21 = vmul.f32 (!%p2244_p7), %v4118_v40, %v4526_v47  ;;  %v1774_v11 = vmul.f32 (!%p2244_p7), %v4126_v44, %v4526_v47  ;;  %v1775_v35 = vmul.f32 (!%p2244_p7), %v4526_v47, %v4138_v50  ;;  %v5118_v46 = vld [vmem:[#allocation50_spill] sm:$0xff] (!%p2244_p7)  ;;  %v5120_v14 = vld [vmem:[#allocation59_spill] sm:$0xff] (!%p2244_p7) }
 0x56b   : > { %v1772_v43 = vmul.f32 (!%p2244_p7), %v4526_v47, %v5115_v3  ;;  %v1776_v1 = vmul.f32 (!%p2244_p7), %v4526_v47, %v4146_v54  ;;  %v1777_v6 = vmul.f32 (!%p2244_p7), %v4134_v48, %v4526_v47  ;;  %v1778_v10 = vmul.f32 (!%p2244_p7), %v4142_v52, %v4526_v47  ;;  %v5116_v32 = vld [vmem:[#allocation52_spill] sm:$0xff] (!%p2244_p7)  ;;  %v5119_v12 = vld [vmem:[#allocation54_spill] sm:$0xff] (!%p2244_p7) }
 0x56c   : > { %v1842_v5 = vadd.f32 (!%p2244_p7), %v4528_v2, %v1771_v38  ;;  %v1844_v44 = vadd.f32 (!%p2244_p7), %v4528_v2, %v1773_v21  ;;  %v1845_v50 = vadd.f32 (!%p2244_p7), %v4528_v2, %v1774_v11  ;;  %v1846_v54 = vadd.f32 (!%p2244_p7), %v4528_v2, %v1775_v35  ;;  %v5117_v4 = vld [vmem:[#allocation56_spill] sm:$0xff] (!%p2244_p7)  ;;  %v5121_v38 = vld [vmem:[#allocation62_spill] sm:$0xff] (!%p2244_p7)  ;;  %v5123_v11 = vld [vmem:[#allocation61_spill] sm:$0xff] (!%p2244_p7) }
 0x56d   : > { %v1843_v40 = vadd.f32 (!%p2244_p7), %v4528_v2, %v1772_v43  ;;  %v1847_v8 = vadd.f32 (!%p2244_p7), %v4528_v2, %v1776_v1  ;;  %v1848_v48 = vadd.f32 (!%p2244_p7), %v4528_v2, %v1777_v6  ;;  %v1849_v52 = vadd.f32 (!%p2244_p7), %v4528_v2, %v1778_v10  ;;  %v5122_v43 = vld [vmem:[#allocation58_spill] sm:$0xff] (!%p2244_p7) }
 0x56e   : > { %1906 = vst [vmem:[%s4247_s27] sm:$0xff] (!%p2244_p7), %v1842_v5  ;;  %1908 = vst [vmem:[%s4247_s27 + $0x10] sm:$0xff] (!%p2244_p7), %v1844_v44  ;;  %v1779_v42 = vmul.f32 (!%p2244_p7), %v4526_v47, %v4154_v58  ;;  %v1780_v25 = vmul.f32 (!%p2244_p7), %v4526_v47, %v4162_v62  ;;  %v1781_v39 = vmul.f32 (!%p2244_p7), %v4150_v56, %v4526_v47 }
 0x56f   : > { %1907 = vst [vmem:[%s4247_s27 + $0x8] sm:$0xff] (!%p2244_p7), %v1843_v40  ;;  %1909 = vst [vmem:[%s4247_s27 + $0x18] sm:$0xff] (!%p2244_p7), %v1845_v50  ;;  %v1782_v31 = vmul.f32 (!%p2244_p7), %v4158_v60, %v4526_v47  ;;  %v1783_v58 = vmul.f32 (!%p2244_p7), %v4526_v47, %v5116_v32  ;;  %v1784_v62 = vmul.f32 (!%p2244_p7), %v4526_v47, %v5117_v4 }
 0x570   : > { %1910 = vst [vmem:[%s4247_s27 + $0x20] sm:$0xff] (!%p2244_p7), %v1846_v54  ;;  %1911 = vst [vmem:[%s4247_s27 + $0x28] sm:$0xff] (!%p2244_p7), %v1847_v8  ;;  %v1785_v56 = vmul.f32 (!%p2244_p7), %v5118_v46, %v4526_v47  ;;  %v1786_v60 = vmul.f32 (!%p2244_p7), %v5119_v12, %v4526_v47  ;;  %v1850_v36 = vadd.f32 (!%p2244_p7), %v4528_v2, %v1779_v42 }
 0x571   : > { %1912 = vst [vmem:[%s4247_s27 + $0x30] sm:$0xff] %v1848_v48  ;;  %1913 = vst [vmem:[%s4247_s27 + $0x38] sm:$0xff] %v1849_v52  ;;  %v1851_v37 = vadd.f32 %v4528_v2, %v1780_v25  ;;  %v1852_v33 = vadd.f32 %v4528_v2, %v1781_v39  ;;  %v1853_v7 = vadd.f32 %v4528_v2, %v1782_v31  ;;  %v5124_v25 = vld [vmem:[#allocation75_spill] sm:$0xff]  ;;  %v5125_v39 = vld [vmem:[#allocation70_spill] sm:$0xff] }
 0x572   : > { %v1854_v23 = vadd.f32 %v4528_v2, %v1783_v58  ;;  %v1855_v0 = vadd.f32 %v4528_v2, %v1784_v62  ;;  %v1856_v29 = vadd.f32 %v4528_v2, %v1785_v56  ;;  %v1857_v15 = vadd.f32 %v4528_v2, %v1786_v60  ;;  %1914 = vst [vmem:[%s4247_s27 + $0x40] sm:$0xff] %v1850_v36  ;;  %v5126_v31 = vld [vmem:[#allocation73_spill] sm:$0xff]  ;;  %v5127_v60 = vld [vmem:[#allocation47_spill] sm:$0xff] }
 0x573   : > { %1915 = vst [vmem:[%s4247_s27 + $0x48] sm:$0xff] %v1851_v37  ;;  %1916 = vst [vmem:[%s4247_s27 + $0x50] sm:$0xff] %v1852_v33  ;;  %v1787_v27 = vmul.f32 %v4526_v47, %v5120_v14  ;;  %v1788_v3 = vmul.f32 %v4526_v47, %v5121_v38  ;;  %v1789_v21 = vmul.f32 %v5122_v43, %v4526_v47  ;;  %v5128_v37 = vld [vmem:[#allocation49_spill] sm:$0xff] }
 0x574   : > { %1917 = vst [vmem:[%s4247_s27 + $0x58] sm:$0xff] %v1853_v7  ;;  %v1790_v35 = vmul.f32 %v5123_v11, %v4526_v47  ;;  %1918 = vst [vmem:[%s4247_s27 + $0x60] sm:$0xff] %v1854_v23  ;;  %v1791_v1 = vmul.f32 %v4526_v47, %v4202_v18  ;;  %v1792_v6 = vmul.f32 %v4526_v47, %v4210_v22 }
 0x575   : > { %1919 = vst [vmem:[%s4247_s27 + $0x68] sm:$0xff] %v1855_v0  ;;  %1920 = vst [vmem:[%s4247_s27 + $0x70] sm:$0xff] %v1856_v29  ;;  %v1793_v10 = vmul.f32 %v4198_v16, %v4526_v47  ;;  %v1794_v5 = vmul.f32 %v4206_v20, %v4526_v47  ;;  %v1858_v40 = vadd.f32 %v4528_v2, %v1787_v27 }
 0x576   : > { %1921 = vst [vmem:[%s4247_s27 + $0x78] sm:$0xff] %v1857_v15  ;;  %v1859_v44 = vadd.f32 %v4528_v2, %v1788_v3  ;;  %v1860_v50 = vadd.f32 %v4528_v2, %v1789_v21  ;;  %v1861_v18 = vadd.f32 %v4528_v2, %v1790_v35  ;;  %v1862_v22 = vadd.f32 %v4528_v2, %v1791_v1  ;;  %v5129_v35 = vld [vmem:[#allocation53_spill] sm:$0xff] }
 0x577   : > { %v1863_v54 = vadd.f32 %v4528_v2, %v1792_v6  ;;  %v1864_v16 = vadd.f32 %v4528_v2, %v1793_v10  ;;  %v1865_v20 = vadd.f32 %v4528_v2, %v1794_v5  ;;  %1922 = vst [vmem:[%s4247_s27 + $0x80] sm:$0xff] %v1858_v40  ;;  %v1795_v8 = vmul.f32 %v4526_v47, %v4218_v26  ;;  %v5130_v1 = vld [vmem:[#allocation57_spill] sm:$0xff]  ;;  %v5131_v6 = vld [vmem:[#allocation51_spill] sm:$0xff] }
 0x578   : > { %1923 = vst [vmem:[%s4247_s27 + $0x88] sm:$0xff] %v1859_v44  ;;  %1924 = vst [vmem:[%s4247_s27 + $0x90] sm:$0xff] %v1860_v50  ;;  %v1796_v48 = vmul.f32 %v4526_v47, %v4226_v30  ;;  %v1797_v52 = vmul.f32 %v4214_v24, %v4526_v47  ;;  %v1798_v42 = vmul.f32 %v4222_v28, %v4526_v47  ;;  %v5132_v10 = vld [vmem:[#allocation55_spill] sm:$0xff] }
 0x579   : > { %1925 = vst [vmem:[%s4247_s27 + $0x98] sm:$0xff] %v1861_v18  ;;  %1926 = vst [vmem:[%s4247_s27 + $0xa0] sm:$0xff] %v1862_v22  ;;  %v1799_v26 = vmul.f32 %v4526_v47, %v4234_v34  ;;  %v1800_v30 = vmul.f32 %v4526_v47, %v5124_v25  ;;  %v1801_v24 = vmul.f32 %v5125_v39, %v4526_v47 }
 0x57a   : > { %1927 = vst [vmem:[%s4247_s27 + $0xa8] sm:$0xff] %v1863_v54  ;;  %1928 = vst [vmem:[%s4247_s27 + $0xb0] sm:$0xff] %v1864_v16  ;;  %v1802_v28 = vmul.f32 %v5126_v31, %v4526_v47  ;;  %v1866_v32 = vadd.f32 %v4528_v2, %v1795_v8  ;;  %v1867_v58 = vadd.f32 %v4528_v2, %v1796_v48  ;;  %v5134_v48 = vld [vmem:[#allocation63_spill] sm:$0xff] }
 0x57b   : > { %1929 = vst [vmem:[%s4247_s27 + $0xb8] sm:$0xff] %v1865_v20  ;;  %v1868_v4 = vadd.f32 %v4528_v2, %v1797_v52  ;;  %v1869_v34 = vadd.f32 %v4528_v2, %v1798_v42  ;;  %v1870_v62 = vadd.f32 %v4528_v2, %v1799_v26  ;;  %v1871_v46 = vadd.f32 %v4528_v2, %v1800_v30  ;;  %v5133_v20 = vld [vmem:[#allocation60_spill] sm:$0xff]  ;;  %v5135_v30 = vld [vmem:[#allocation65_spill] sm:$0xff] }
 0x57c   : > { %v1872_v56 = vadd.f32 %v4528_v2, %v1801_v24  ;;  %v1873_v12 = vadd.f32 %v4528_v2, %v1802_v28  ;;  %1930 = vst [vmem:[%s4247_s27 + $0xc0] sm:$0xff] %v1866_v32  ;;  %1931 = vst [vmem:[%s4247_s27 + $0xc8] sm:$0xff] %v1867_v58  ;;  %v1803_v36 = vmul.f32 %v4526_v47, %v5127_v60  ;;  %v5136_v24 = vld [vmem:[#allocation64_spill] sm:$0xff]  ;;  %v5139_v60 = vld [vmem:[#allocation66_spill] sm:$0xff] }
 0x57d   : > { %1932 = vst [vmem:[%s4247_s27 + $0xd0] sm:$0xff] %v1868_v4  ;;  %1933 = vst [vmem:[%s4247_s27 + $0xd8] sm:$0xff] %v1869_v34  ;;  %v1804_v33 = vmul.f32 %v4526_v47, %v5128_v37  ;;  %v1805_v7 = vmul.f32 %v4120_v41, %v4526_v47  ;;  %v1806_v23 = vmul.f32 %v4128_v45, %v4526_v47  ;;  %v5140_v37 = vld [vmem:[#allocation68_spill] sm:$0xff] }
 0x57e   : > { %1934 = vst [vmem:[%s4247_s27 + $0xe0] sm:$0xff] %v1870_v62  ;;  %1935 = vst [vmem:[%s4247_s27 + $0xe8] sm:$0xff] %v1871_v46  ;;  %v1807_v0 = vmul.f32 %v4526_v47, %v4140_v51  ;;  %v1808_v29 = vmul.f32 %v4526_v47, %v4148_v55  ;;  %v1809_v41 = vmul.f32 %v4136_v49, %v4526_v47  ;;  %v5137_v62 = vld [vmem:[#allocation67_spill] sm:$0xff] }
 0x57f   : > { %1936 = vst [vmem:[%s4247_s27 + $0xf0] sm:$0xff] %v1872_v56  ;;  %1937 = vst [vmem:[%s4247_s27 + $0xf8] sm:$0xff] %v1873_v12  ;;  %v1810_v45 = vmul.f32 %v4144_v53, %v4526_v47  ;;  %v1874_v15 = vadd.f32 %v4528_v2, %v1803_v36  ;;  %v1875_v14 = vadd.f32 %v4528_v2, %v1804_v33  ;;  %v5138_v56 = vld [vmem:[#allocation69_spill] sm:$0xff] }
 0x580   : > { %v1876_v27 = vadd.f32 %v4528_v2, %v1805_v7  ;;  %v1877_v51 = vadd.f32 %v4528_v2, %v1806_v23  ;;  %v1878_v55 = vadd.f32 %v4528_v2, %v1807_v0  ;;  %v1879_v38 = vadd.f32 %v4528_v2, %v1808_v29  ;;  %v5141_v7 = vld [vmem:[#allocation72_spill] sm:$0xff] }
 0x581   : > { %v1880_v49 = vadd.f32 %v4528_v2, %v1809_v41  ;;  %v1881_v53 = vadd.f32 %v4528_v2, %v1810_v45  ;;  %1938 = vst [vmem:[%s4247_s27 + $0x100] sm:$0xff] %v1874_v15  ;;  %1939 = vst [vmem:[%s4247_s27 + $0x108] sm:$0xff] %v1875_v14  ;;  %v1811_v3 = vmul.f32 %v4526_v47, %v4156_v59  ;;  %v5142_v0 = vld [vmem:[#allocation76_spill] sm:$0xff]  ;;  %v5143_v41 = vld [vmem:[#allocation71_spill] sm:$0xff] }
 0x582   : > { %1940 = vst [vmem:[%s4247_s27 + $0x110] sm:$0xff] %v1876_v27  ;;  %1941 = vst [vmem:[%s4247_s27 + $0x118] sm:$0xff] %v1877_v51  ;;  %v1812_v43 = vmul.f32 %v4526_v47, %v4164_v63  ;;  %v1813_v21 = vmul.f32 %v4152_v57, %v4526_v47  ;;  %v1814_v11 = vmul.f32 %v4160_v61, %v4526_v47  ;;  %v5144_v15 = vld [vmem:[#allocation74_spill] sm:$0xff] }
 0x583   : > { %1942 = vst [vmem:[%s4247_s27 + $0x120] sm:$0xff] %v1878_v55  ;;  %1943 = vst [vmem:[%s4247_s27 + $0x128] sm:$0xff] %v1879_v38  ;;  %v1815_v59 = vmul.f32 %v4526_v47, %v5129_v35  ;;  %v1816_v63 = vmul.f32 %v4526_v47, %v5130_v1  ;;  %v1817_v57 = vmul.f32 %v5131_v6, %v4526_v47 }
 0x584   : > { %1944 = vst [vmem:[%s4247_s27 + $0x130] sm:$0xff] %v1880_v49  ;;  %1945 = vst [vmem:[%s4247_s27 + $0x138] sm:$0xff] %v1881_v53  ;;  %v1818_v61 = vmul.f32 %v5132_v10, %v4526_v47  ;;  %v1882_v5 = vadd.f32 %v4528_v2, %v1811_v3  ;;  %v1883_v40 = vadd.f32 %v4528_v2, %v1812_v43 }
 0x585   : > { %v1884_v44 = vadd.f32 %v4528_v2, %v1813_v21  ;;  %v1885_v50 = vadd.f32 %v4528_v2, %v1814_v11  ;;  %v1886_v18 = vadd.f32 %v4528_v2, %v1815_v59  ;;  %v1887_v22 = vadd.f32 %v4528_v2, %v1816_v63 }
 0x586   : > { %v1888_v54 = vadd.f32 %v4528_v2, %v1817_v57  ;;  %v1889_v16 = vadd.f32 %v4528_v2, %v1818_v61  ;;  %1946 = vst [vmem:[%s4247_s27 + $0x140] sm:$0xff] %v1882_v5  ;;  %1947 = vst [vmem:[%s4247_s27 + $0x148] sm:$0xff] %v1883_v40  ;;  %v1819_v8 = vmul.f32 %v4526_v47, %v5133_v20 }
 0x587   : > { %1948 = vst [vmem:[%s4247_s27 + $0x150] sm:$0xff] %v1884_v44  ;;  %1949 = vst [vmem:[%s4247_s27 + $0x158] sm:$0xff] %v1885_v50  ;;  %v1820_v52 = vmul.f32 %v4526_v47, %v5134_v48  ;;  %v1821_v42 = vmul.f32 %v4184_v9, %v4526_v47  ;;  %v1822_v26 = vmul.f32 %v4192_v13, %v4526_v47 }
 0x588   : > { %1950 = vst [vmem:[%s4247_s27 + $0x160] sm:$0xff] %v1886_v18  ;;  %1951 = vst [vmem:[%s4247_s27 + $0x168] sm:$0xff] %v1887_v22  ;;  %v1823_v25 = vmul.f32 %v4526_v47, %v4204_v19  ;;  %v1824_v39 = vmul.f32 %v4526_v47, %v5135_v30  ;;  %v1825_v9 = vmul.f32 %v4200_v17, %v4526_v47 }
 0x589   : > { %1952 = vst [vmem:[%s4247_s27 + $0x170] sm:$0xff] %v1888_v54  ;;  %1953 = vst [vmem:[%s4247_s27 + $0x178] sm:$0xff] %v1889_v16  ;;  %v1826_v13 = vmul.f32 %v5136_v24, %v4526_v47  ;;  %v1890_v31 = vadd.f32 %v4528_v2, %v1819_v8  ;;  %v1891_v28 = vadd.f32 %v4528_v2, %v1820_v52 }
 0x58a   : > { %v1892_v32 = vadd.f32 %v4528_v2, %v1821_v42  ;;  %v1893_v19 = vadd.f32 %v4528_v2, %v1822_v26  ;;  %v1894_v58 = vadd.f32 %v4528_v2, %v1823_v25  ;;  %v1895_v4 = vadd.f32 %v4528_v2, %v1824_v39 }
 0x58b   : > { %v1896_v17 = vadd.f32 %v4528_v2, %v1825_v9  ;;  %v1897_v34 = vadd.f32 %v4528_v2, %v1826_v13  ;;  %1954 = vst [vmem:[%s4247_s27 + $0x180] sm:$0xff] %v1890_v31  ;;  %1955 = vst [vmem:[%s4247_s27 + $0x188] sm:$0xff] %v1891_v28  ;;  %v1827_v46 = vmul.f32 %v4526_v47, %v5137_v62 }
 0x58c   : > { %1956 = vst [vmem:[%s4247_s27 + $0x190] sm:$0xff] %v1892_v32  ;;  %1957 = vst [vmem:[%s4247_s27 + $0x198] sm:$0xff] %v1893_v19  ;;  %v1828_v12 = vmul.f32 %v4526_v47, %v5138_v56  ;;  %v1829_v36 = vmul.f32 %v5139_v60, %v4526_v47  ;;  %v1830_v33 = vmul.f32 %v5140_v37, %v4526_v47 }
 0x58d   : > { %1958 = vst [vmem:[%s4247_s27 + $0x1a0] sm:$0xff] %v1894_v58  ;;  %1959 = vst [vmem:[%s4247_s27 + $0x1a8] sm:$0xff] %v1895_v4  ;;  %v1831_v23 = vmul.f32 %v4526_v47, %v5141_v7  ;;  %v1832_v29 = vmul.f32 %v4526_v47, %v5142_v0  ;;  %v1833_v45 = vmul.f32 %v5143_v41, %v4526_v47 }
 0x58e   : > { %1960 = vst [vmem:[%s4247_s27 + $0x1b0] sm:$0xff] %v1896_v17  ;;  %1961 = vst [vmem:[%s4247_s27 + $0x1b8] sm:$0xff] %v1897_v34  ;;  %v1834_v14 = vmul.f32 %v5144_v15, %v4526_v47  ;;  %v1898_v27 = vadd.f32 %v4528_v2, %v1827_v46  ;;  %v1899_v51 = vadd.f32 %v4528_v2, %v1828_v12 }
 0x58f   : > { %v1900_v55 = vadd.f32 %v4528_v2, %v1829_v36  ;;  %v1901_v38 = vadd.f32 %v4528_v2, %v1830_v33  ;;  %v1902_v49 = vadd.f32 %v4528_v2, %v1831_v23  ;;  %v1903_v53 = vadd.f32 %v4528_v2, %v1832_v29 }
 0x590   : > { %v1904_v3 = vadd.f32 %v4528_v2, %v1833_v45  ;;  %v1905_v43 = vadd.f32 %v4528_v2, %v1834_v14  ;;  %1962 = vst [vmem:[%s4247_s27 + $0x1c0] sm:$0xff] %v1898_v27  ;;  %1963 = vst [vmem:[%s4247_s27 + $0x1c8] sm:$0xff] %v1899_v51 }
 0x591   : > { %1964 = vst [vmem:[%s4247_s27 + $0x1d0] sm:$0xff] %v1900_v55  ;;  %1965 = vst [vmem:[%s4247_s27 + $0x1d8] sm:$0xff] %v1901_v38 }
 0x592   : > { %1966 = vst [vmem:[%s4247_s27 + $0x1e0] sm:$0xff] %v1902_v49  ;;  %1967 = vst [vmem:[%s4247_s27 + $0x1e8] sm:$0xff] %v1903_v53 }
 0x593   : > { %1968 = vst [vmem:[%s4247_s27 + $0x1f0] sm:$0xff] %v1904_v3  ;;  %1969 = vst [vmem:[%s4247_s27 + $0x1f8] sm:$0xff] %v1905_v43 }
 0x594 PF: > { %s5145_s30 = sld [smem:[#allocation29_spill]]  ;;  %s5146_s21 = sld [smem:[#allocation28_spill]] }
 0x595   : > { %s5147_s8 = sld [smem:[#allocation30_spill]]  ;;  %s5148_s26 = sld [smem:[#allocation31_spill]] }
 0x596   : > { %s5150_s25 = sld [smem:[#allocation39_spill]]  ;;  %s1989_s17 = sshll.u32 %s4247_s27, 4  ;;  %s4791_s17 = int_to_ptr.vmem [resolvable:$true] %s1989_s17 }
 0x597   : > { %s5151_s16 = sld [smem:[#allocation83_spill]]  ;;  %s4800_s28 = scalar_lea.sflag [#allocation8], %s458_s13 }
 0x598   : > { %s3383_s24 = scalar_lea.vmem %s4791_s17, 8192  ;;  %s3590_s27 = smov [#allocation17]  }
 0x599   : > { %p3384_p4 = scmp.ne.s32.totalorder %s4791_s17, %s3383_s24 }
 0x59a   : > { %s1978_s9 = smul.u32 %s5146_s21, %s5145_s30  ;;  %s3387_s30 = sshll.u32 %s3590_s27, 4  ;;  %s3388_s30 = int_to_ptr.vmem [resolvable:$false] %s3387_s30 }
 0x59b   : > { %s2249_s6 = sshll.u32 %s5147_s8, 7  ;;  %s2250_s15 = sshll.u32 %s5148_s26, 8 }
 0x59c   : > { %s2248_s4 = sshll.u32 %s1978_s9, 6  ;;  %p5152_p10 = scmp.ne.s32.totalorder %s5150_s25, 0 }
 0x59d   : > { %s1984_s18 = sadd.s32 %s2249_s6, %s2248_s4  ;;  %s3389_s21 = scalar_lea.vmem %s3388_s30, 16384 }
 0x59e   : > { %s1986_s22 = sadd.s32 %s2250_s15, %s1984_s18  ;;  %p3385_p9 = pnand %p3384_p4, %p5152_p10 }
 0x59f   : > { %s2251_s19 = sshll.u32 %s1986_s22, 7  ;;  %p3390_p11 = scmp.lt.s32.totalorder %s4791_s17, %s3388_s30 }
 0x5a0   : > { %s4796_s2 = scalar_lea.hbm %s5151_s16, %s2251_s19  ;;  %p3386_p12 = pneg %p3385_p9 }
 0x5a1   : > { %p3391_p2 = scmp.lt.s32.totalorder %s3389_s21, %s3383_s24 }
 0x5a3   : > { %p3392_p6 = por %p3391_p2, %p3390_p11 }
 0x5a5   : > { %p3393_p8 = pnand %p3392_p6, %p3386_p12 }
 0x5a7   : > { %3396 = shalt.err (!%p3393_p8)
}
 0x5a8   : > { %s3397_s13 = scalar_lea.hbm %s4796_s2, 8192  ;;  %s3401_s7 = scalar_lea.hbm %s5151_s16, 131072 }
 0x5a9   : > { %p3398_p1 = scmp.ne.s32.totalorder %s4796_s2, %s3397_s13  ;;  %p3402_p3 = scmp.lt.u32.totalorder %s4796_s2, %s5151_s16 }
 0x5aa   : > { %p3403_p0 = scmp.lt.u32.totalorder %s3401_s7, %s3397_s13  ;;  %p3405_p4 = scmp.lt.u32.totalorder %s3397_s13, %s4796_s2 }
 0x5ab   : > { %p3399_p13 = pnand %p3398_p1, %p5152_p10 }
 0x5ac   : > { %p3404_p7 = por %p3403_p0, %p3402_p3 }
 0x5ad   : > { %p3400_p5 = pneg %p3399_p13 }
 0x5ae   : > { %p3406_p9 = por %p3405_p4, %p3404_p7 }
 0x5b0   : > { %p3407_p12 = pnand %p3406_p9, %p3400_p5 }
 0x5b2   : > { %3410 = shalt.err (!%p3407_p12)
}
 0x5b3   : > { %s3591_s15 = smov 128   ;;  %s3592_s4 = smov 8  }
 0x5b4   : > { %2977 = dma.vmem_to_hbm [thread:$0]  (%p5152_p10), %s4791_s17, 8192, %s4796_s2, %s4800_s28, %s3591_s15, %s3591_s15, %s3592_s4  }
 0x5b5 PF: > { %s5153_s18 = sld [smem:[#allocation23_spill]]  ;;  %s5154_s22 = sld [smem:[#allocation40_spill]] }
 0x5b6   : > { %p3006_p11 = scmp.ge.s32.totalorder %s3573_s14, 2 }
 0x5bb   : > { %s2004_s19 = sand.u32 1, %s5153_s18   ;;  %p5155_p2 = scmp.ne.s32.totalorder %s5154_s22, 0 }
 0x5bc   : > { %s2005_s20 = scalar_lea.sflag [#allocation8], %s2004_s19 }
 0x5bd   : > { %p3000_p6 = pnand %p3006_p11, %p5155_p2 }
 0x5bf   : > { %3500 = dma.done.wait (!%p3000_p6), %s2005_s20, 8192  }
 0x5c0   : > { %3502 = vsyncadd (!%p3000_p6), %s2005_s20, 4294959104  ;;  %s29_s14 = sadd.s32 1, %s3573_s14   ;;  %s5157_s21 = sld [smem:[#allocation24_spill]] }
 0x5c1   : > { %p4829_p8 = scmp.ge.s32.totalorder %s29_s14, 34   ;;  %s5158_s24 = sld [smem:[#allocation25_spill]] }
 0x5c2   : > { %s5159_s25 = sld [smem:[#allocation26_spill]]  ;;  %s5160_s27 = sld [smem:[#allocation27_spill]] }
 0x5c3   : > { %s5161_s30 = sld [smem:[#allocation32_spill]]  ;;  %s5162_s7 = sld [smem:[#allocation33_spill]] }
 0x5c4   : > { %s5163_s8 = sld [smem:[#allocation34_spill]]  ;;  %s5164_s9 = sld [smem:[#allocation35_spill]] }
 0x5c5   : > { %s5165_s17 = sld [smem:[#allocation42_spill]]  ;;  %s5166_s2 = sld [smem:[#allocation43_spill]] }
 0x5c6   : > { %s5167_s13 = sld [smem:[#allocation44_spill]]  ;;  %s5168_s6 = sld [smem:[#allocation45_spill]] }
 0x5c7   : > { %s5169_s22 = smov %s3513_s23  ;;  %s5170_s23 = smov %s3933_s10 }
 0x5c8   : > { %s5171_s26 = smov %s5193_s11  ;;  %s5172_s28 = smov %s3537_s29 }
 0x5c9   : > { %s5173_s29 = smov %s3928_s12  ;;  %28 = sbr.rel (!%p4829_p8) target bundleno = 25 (0x19), region = 157 }
 0x5cb   : > { %s5174_s10 = smov %s5165_s17  ;;  %s5175_s11 = smov %s5166_s2 }
 0x5cc   : > { %s5176_s12 = smov %s5167_s13  ;;  %s5177_s13 = smov %s5168_s6 }
 0x5d0   :  { %2010 = vsyncpa [#allocation7], 1 }
 0x5d1   :  { %2012 = vsyncpa [#allocation7 + $0x1], 1 }
 0x5d2   :  { %2013 = vsyncpa [#allocation10], 1 }
 0x5d3   :  { %2015 = vsyncpa [#allocation10 + $0x1], 1 }
 0x5d4   :  { %2016 = vsyncpa [#allocation13], 1 }
 0x5d5   :  { %2018 = vsyncpa [#allocation13 + $0x1], 1 }
 0x5d6   :  { %2019 = vsyncpa [#allocation16], 1 }
 0x5d7   :  { %2020 = vsyncpa [#allocation8], 1 }
 0x5d8   :  { %2022 = vsyncpa [#allocation8 + $0x1], 1 }

</bundles_post_ra>
